<compile_context>
chip_gen: v7x
topology: tpu7x:2x2x1
jax: 0.10.0
libtpu: 0.0.40
codegen_flags: <defaults>
</compile_context>

<pallas_src>
import functools
import math

import jax
import jax.numpy as jnp
from jax import lax
from jax.experimental import pallas as pl
from jax.experimental.pallas import tpu as pltpu


# ---------------------------------------------------------------------------
# Helpers
# ---------------------------------------------------------------------------
def _layernorm(x, w, b, eps):
    mean = jnp.mean(x, axis=-1, keepdims=True)
    var = jnp.mean(jnp.square(x - mean), axis=-1, keepdims=True)
    return (x - mean) * lax.rsqrt(var + eps) * w + b


def _gelu_erf(x):
    # torch.nn.functional.gelu default (erf based)
    return 0.5 * x * (1.0 + lax.erf(x * (1.0 / math.sqrt(2.0))))


# ---------------------------------------------------------------------------
# Fused encoder kernel: one (batch block, layer) per grid step.
# ---------------------------------------------------------------------------
def cocolm_encoder_kernel(
    x_ref, mask_ref,
    wq_ref, wk_ref, wv_ref, wo_ref, w1_ref, w2_ref,
    vecd_ref, b1_ref,
    out_ref,
    h_sc, o_sc, madd_sc,
    *, num_heads, head_dim, batch_block, seq_len, eps, compute_dtype,
):
    l = pl.program_id(1)
    H, hd, Bb, S = num_heads, head_dim, batch_block, seq_len
    cdt = compute_dtype
    scaling = float(hd) ** -0.5

    # First layer for this batch block: load the activation into the resident
    # VMEM carry and precompute the additive key-padding mask (layer-invariant).
    @pl.when(l == 0)
    def _():
        h_sc[...] = x_ref[...].astype(jnp.float32)
        madd_sc[...] = jnp.where(
            mask_ref[...] > 0.5, -jnp.inf, 0.0
        ).astype(jnp.float32)

    x = h_sc[...]                                   # (Bb*S, D) f32

    # Packed per-layer vectors (all f32): rows are
    # [bq, bk, bv, bo, ln1_w, ln1_b, b2, ln2_w, ln2_b]
    vec = vecd_ref[0]                               # (9, D)
    bq, bk, bv, bo = vec[0:1], vec[1:2], vec[2:3], vec[3:4]
    ln1w, ln1b = vec[4:5], vec[5:6]
    b2 = vec[6:7]
    ln2w, ln2b = vec[7:8], vec[8:9]
    b1 = b1_ref[0]                                  # (1, I)

    # --- SelfMultiheadAttention -------------------------------------------
    # Full-width, lane-aligned projections over the whole batch block
    # (bf16 MXU operands, f32 accumulation).
    xc = x.astype(cdt)
    q = (jnp.dot(xc, wq_ref[0], preferred_element_type=jnp.float32) + bq) * scaling
    k = jnp.dot(xc, wk_ref[0], preferred_element_type=jnp.float32) + bk
    v = jnp.dot(xc, wv_ref[0], preferred_element_type=jnp.float32) + bv
    qc, kc, vc = q.astype(cdt), k.astype(cdt), v.astype(cdt)

    # Per-(batch-element, head) attention on lane slices; each head's output
    # is written back into its lane slice of o_sc (the head concat), so the
    # output projection below is a single full-K matmul.
    for b in range(Bb):
        r0 = b * S
        neg = madd_sc[b:b + 1, :]                   # (1, S) additive -inf/0
        for h in range(H):
            c0 = h * hd
            qh = qc[r0:r0 + S, c0:c0 + hd]          # (S, hd)
            kh = kc[r0:r0 + S, c0:c0 + hd]
            vh = vc[r0:r0 + S, c0:c0 + hd]
            s = lax.dot_general(qh, kh, (((1,), (1,)), ((), ())),
                                preferred_element_type=jnp.float32)   # (S, S)
            s = s + neg
            smax = jnp.max(s, axis=-1, keepdims=True)
            e = jnp.exp(s - smax)
            p = e * pl.reciprocal(jnp.sum(e, axis=-1, keepdims=True), approx=True)
            oh = jnp.dot(p.astype(cdt), vh, preferred_element_type=jnp.float32)
            o_sc[r0:r0 + S, c0:c0 + hd] = oh

    attn = jnp.dot(o_sc[...].astype(cdt), wo_ref[0],
                   preferred_element_type=jnp.float32) + bo          # (Bb*S, D)

    # x[x != x] = 0  (fully padded rows produce NaN -> zeroed, as in PyTorch)
    attn = jnp.where(jnp.isnan(attn), 0.0, attn)

    # residual + post-LN (dropout is identity in eval mode)
    x1 = _layernorm(x + attn, ln1w, ln1b, eps)

    # --- COCOLMIntermediate + COCOLMOutput (post-LN) -----------------------
    h1 = _gelu_erf(jnp.dot(x1.astype(cdt), w1_ref[0],
                           preferred_element_type=jnp.float32) + b1)
    h2 = jnp.dot(h1.astype(cdt), w2_ref[0],
                 preferred_element_type=jnp.float32) + b2
    y = _layernorm(h2 + x1, ln2w, ln2b, eps)

    h_sc[...] = y

    @pl.when(l == pl.num_programs(1) - 1)
    def _():
        out_ref[...] = y.astype(out_ref.dtype)


# ---------------------------------------------------------------------------
# Wrapper: stacks / packs per-layer params and issues a single pallas_call.
# ---------------------------------------------------------------------------
def cocolm_encoder_pallas(hidden_states, key_padding_mask, layer_params, *,
                          num_heads, eps=1e-5, compute_dtype=jnp.bfloat16,
                          batch_block=None):
    B, S, D = hidden_states.shape
    L = len(layer_params)
    I = layer_params[0]["w1"].shape[1]
    hd = D // num_heads
    cdt = compute_dtype

    if batch_block is None:
        batch_block = B
    assert B % batch_block == 0, "batch_block must divide batch"
    nb = B // batch_block
    Mblk = batch_block * S

    def stack(name, dtype=None):
        a = jnp.stack([p[name] for p in layer_params], axis=0)
        return a.astype(dtype) if dtype is not None else a

    # One-time host-side param packing (layout prep only, not hot-path work).
    w_in = stack("w_in", cdt)                               # (L, D, 3D)
    wq, wk, wv = (w_in[:, :, i * D:(i + 1) * D] for i in range(3))
    wo = stack("w_out", cdt)                                # (L, D, D)
    w1 = stack("w1", cdt)                                   # (L, D, I)
    w2 = stack("w2", cdt)                                   # (L, I, D)

    b_in = stack("b_in").astype(jnp.float32)                # (L, 1, 3D)
    bq_v, bk_v, bv_v = (b_in[:, 0, i * D:(i + 1) * D] for i in range(3))
    vecd = jnp.stack([                                      # (L, 9, D) f32
        bq_v, bk_v, bv_v,
        stack("b_out")[:, 0, :],
        stack("ln1_w")[:, 0, :], stack("ln1_b")[:, 0, :],
        stack("b2")[:, 0, :],
        stack("ln2_w")[:, 0, :], stack("ln2_b")[:, 0, :],
    ], axis=1).astype(jnp.float32)
    b1 = stack("b1").astype(jnp.float32)                    # (L, 1, I)

    x2d = hidden_states.reshape(B * S, D)
    mask2d = key_padding_mask.reshape(B, S).astype(jnp.float32)

    kernel = functools.partial(
        cocolm_encoder_kernel, num_heads=num_heads, head_dim=hd,
        batch_block=batch_block, seq_len=S, eps=eps, compute_dtype=cdt,
    )

    def per_layer(*dims):
        nz = len(dims)
        return pl.BlockSpec((1,) + dims, lambda b, l, _n=nz: (l,) + (0,) * _n)

    in_specs = [
        pl.BlockSpec((Mblk, D), lambda b, l: (b, 0)),          # hidden (batch block)
        pl.BlockSpec((batch_block, S), lambda b, l: (b, 0)),   # key_padding_mask
        per_layer(D, D), per_layer(D, D), per_layer(D, D),     # Wq, Wk, Wv
        per_layer(D, D),                                       # Wo
        per_layer(D, I), per_layer(I, D),                      # W1, W2
        per_layer(9, D),                                       # packed biases / LN params
        per_layer(1, I),                                       # b1 (intermediate bias)
    ]
    out_specs = pl.BlockSpec((Mblk, D), lambda b, l: (b, 0))

    # Explicit scoped-VMEM budget: double-buffered streamed weights + I/O
    # blocks + resident scratch + rough intermediate headroom.
    wb = int(jnp.dtype(cdt).itemsize)
    xb = int(jnp.dtype(hidden_states.dtype).itemsize)
    w_stream = (4 * D * D + 2 * D * I) * wb + (9 * D + I) * 4
    io_stream = 2 * Mblk * D * xb + batch_block * S * 4
    scratch_bytes = (2 * Mblk * D + batch_block * S) * 4
    interm = Mblk * (6 * D + 2 * I) * 4 + num_heads * S * S * 4
    est = 2 * (w_stream + io_stream) + scratch_bytes + interm + (4 << 20)
    vmem_limit = int(min(max(est, 32 << 20), 64 << 20))

    out2d = pl.pallas_call(
        kernel,
        out_shape=jax.ShapeDtypeStruct((B * S, D), hidden_states.dtype),
        grid_spec=pltpu.PrefetchScalarGridSpec(
            num_scalar_prefetch=0,
            grid=(nb, L),                                     # layer axis last (carry)
            in_specs=in_specs,
            out_specs=out_specs,
            scratch_shapes=[
                pltpu.VMEM((Mblk, D), jnp.float32),           # resident activation
                pltpu.VMEM((Mblk, D), jnp.float32),           # head-concat attention out
                pltpu.VMEM((batch_block, S), jnp.float32),    # additive key-padding mask
            ],
        ),
        compiler_params=pltpu.CompilerParams(
            dimension_semantics=("parallel", "arbitrary"),
            vmem_limit_bytes=vmem_limit,
        ),
    )(x2d, mask2d, wq, wk, wv, wo, w1, w2, vecd, b1)

    # layer_norm_type == 'post', no output_hidden_states / output_attentions.
    return (out2d.reshape(B, S, D),)


# ---------------------------------------------------------------------------
# Pure-JAX reference (mirrors the PyTorch forward) for correctness check
# ---------------------------------------------------------------------------
def cocolm_layer_ref(x, mask, p, *, num_heads, eps=1e-5):
    B, S, D = x.shape
    hd = D // num_heads
    qkv = x @ p["w_in"] + p["b_in"]
    q, k, v = jnp.split(qkv, 3, axis=-1)
    q = q * (hd ** -0.5)
    qh = q.reshape(B, S, num_heads, hd).transpose(0, 2, 1, 3)
    kh = k.reshape(B, S, num_heads, hd).transpose(0, 2, 1, 3)
    vh = v.reshape(B, S, num_heads, hd).transpose(0, 2, 1, 3)
    s = jnp.einsum("bhqd,bhkd->bhqk", qh, kh)
    pad = mask[:, None, None, :] > 0.5
    s = jnp.where(pad, -jnp.inf, s)
    pattn = jax.nn.softmax(s, axis=-1)
    o = jnp.einsum("bhqk,bhkd->bhqd", pattn, vh)
    o = o.transpose(0, 2, 1, 3).reshape(B, S, D)
    o = o @ p["w_out"] + p["b_out"]
    o = jnp.where(jnp.isnan(o), 0.0, o)
    x1 = _layernorm(x + o, p["ln1_w"], p["ln1_b"], eps)
    h1 = _gelu_erf(x1 @ p["w1"] + p["b1"])
    h2 = h1 @ p["w2"] + p["b2"]
    return _layernorm(h2 + x1, p["ln2_w"], p["ln2_b"], eps)


def cocolm_encoder_ref(x, mask, layer_params, *, num_heads, eps=1e-5):
    for p in layer_params:
        x = cocolm_layer_ref(x, mask, p, num_heads=num_heads, eps=eps)
    return x


# ---------------------------------------------------------------------------
# Main
# ---------------------------------------------------------------------------
if __name__ == "__main__":
    B, S, D, H, I, L = 2, 8, 128, 4, 256, 2
    eps = 1e-5

    key = jax.random.PRNGKey(0)

    def init_layer(k):
        ks = jax.random.split(k, 8)
        std = 0.02
        return {
            # nn.Linear weights stored pre-transposed: (in, out) so y = x @ W + b
            "w_in": jax.random.normal(ks[0], (D, 3 * D), jnp.float32) * std,
            "b_in": jax.random.normal(ks[1], (1, 3 * D), jnp.float32) * std,
            "w_out": jax.random.normal(ks[2], (D, D), jnp.float32) * std,
            "b_out": jax.random.normal(ks[3], (1, D), jnp.float32) * std,
            "ln1_w": jnp.ones((1, D), jnp.float32),
            "ln1_b": jnp.zeros((1, D), jnp.float32),
            "w1": jax.random.normal(ks[4], (D, I), jnp.float32) * std,
            "b1": jax.random.normal(ks[5], (1, I), jnp.float32) * std,
            "w2": jax.random.normal(ks[6], (I, D), jnp.float32) * std,
            "b2": jax.random.normal(ks[7], (1, D), jnp.float32) * std,
            "ln2_w": jnp.ones((1, D), jnp.float32),
            "ln2_b": jnp.zeros((1, D), jnp.float32),
        }

    key, *layer_keys = jax.random.split(key, L + 1)
    layer_params = [init_layer(k) for k in layer_keys]

    key, xk = jax.random.split(key)
    hidden_states = jax.random.normal(xk, (B, S, D), jnp.float32)

    # key_padding_mask: (B, S), 1.0 = padded key (batch 1 has last 2 padded)
    key_padding_mask = jnp.zeros((B, S), jnp.float32).at[1, -2:].set(1.0)

    ref = cocolm_encoder_ref(
        hidden_states, key_padding_mask, layer_params, num_heads=H, eps=eps
    )

    # f32 path: near-exact (only the EUP approximate-reciprocal softmax divide).
    out_f32 = cocolm_encoder_pallas(
        hidden_states, key_padding_mask, layer_params,
        num_heads=H, eps=eps, compute_dtype=jnp.float32,
    )[0]
    out_f32 = jax.block_until_ready(out_f32)
    assert out_f32.shape == (B, S, D)
    assert jnp.all(jnp.isfinite(out_f32))
    assert jnp.allclose(out_f32, ref, atol=2e-3, rtol=2e-3), float(
        jnp.max(jnp.abs(out_f32 - ref))
    )

    # bf16-operand path (the recommended production config): bf16 MXU inputs,
    # f32 accumulation / softmax / LayerNorm.
    out_bf16 = cocolm_encoder_pallas(
        hidden_states, key_padding_mask, layer_params,
        num_heads=H, eps=eps, compute_dtype=jnp.bfloat16,
    )[0]
    out_bf16 = jax.block_until_ready(out_bf16)
    assert jnp.all(jnp.isfinite(out_bf16))
    assert jnp.allclose(out_bf16, ref, atol=2.5e-2, rtol=2.5e-2), float(
        jnp.max(jnp.abs(out_bf16 - ref))
    )

    print("KERNEL_OK")
</pallas_src>

<mosaic_0001>
module attributes {stable_mosaic.version = 11 : i64} {
  func.func @cocolm_encoder_kernel(%arg0: i32, %arg1: i32, %arg2: memref<16x128xf32, #tpu.memory_space<vmem>>, %arg3: memref<2x8xf32, #tpu.memory_space<vmem>>, %arg4: memref<1x128x128xf32, #tpu.memory_space<vmem>>, %arg5: memref<1x128x128xf32, #tpu.memory_space<vmem>>, %arg6: memref<1x128x128xf32, #tpu.memory_space<vmem>>, %arg7: memref<1x128x128xf32, #tpu.memory_space<vmem>>, %arg8: memref<1x128x256xf32, #tpu.memory_space<vmem>>, %arg9: memref<1x256x128xf32, #tpu.memory_space<vmem>>, %arg10: memref<1x9x128xf32, #tpu.memory_space<vmem>>, %arg11: memref<1x1x256xf32, #tpu.memory_space<vmem>>, %arg12: memref<16x128xf32, #tpu.memory_space<vmem>>, %arg13: memref<16x128xf32, #tpu.memory_space<vmem>>, %arg14: memref<16x128xf32, #tpu.memory_space<vmem>>, %arg15: memref<2x8xf32, #tpu.memory_space<vmem>>) attributes {dimension_semantics = [#tpu.dimension_semantics<parallel>, #tpu.dimension_semantics<arbitrary>], iteration_bounds = array<i64: 1, 2>, scalar_prefetch = 0 : i64, scratch_operands = 3 : i64, tpu.core_type = #tpu.core_type<tc>, window_params = [{transform_indices = @transform_0, window_bounds = array<i64: 16, 128>}, {transform_indices = @transform_1, window_bounds = array<i64: 2, 8>}, {transform_indices = @transform_2, window_bounds = array<i64: 1, 128, 128>}, {transform_indices = @transform_3, window_bounds = array<i64: 1, 128, 128>}, {transform_indices = @transform_4, window_bounds = array<i64: 1, 128, 128>}, {transform_indices = @transform_5, window_bounds = array<i64: 1, 128, 128>}, {transform_indices = @transform_6, window_bounds = array<i64: 1, 128, 256>}, {transform_indices = @transform_7, window_bounds = array<i64: 1, 256, 128>}, {transform_indices = @transform_8, window_bounds = array<i64: 1, 9, 128>}, {transform_indices = @transform_9, window_bounds = array<i64: 1, 1, 256>}, {transform_indices = @transform_10, window_bounds = array<i64: 16, 128>}]} {
    %c0_i32 = arith.constant 0 : i32
    %0 = arith.cmpi eq, %arg1, %c0_i32 : i32
    %1 = arith.extui %0 : i1 to i32
    %c0_i32_0 = arith.constant 0 : i32
    %2 = arith.cmpi ne, %1, %c0_i32_0 : i32
    scf.if %2 {
      %c0_98 = arith.constant 0 : index
      %c0_99 = arith.constant 0 : index
      %257 = vector.load %arg2[%c0_98, %c0_99] : memref<16x128xf32, #tpu.memory_space<vmem>>, vector<16x128xf32>
      %c0_100 = arith.constant 0 : index
      %c0_101 = arith.constant 0 : index
      %258 = vector.load %arg13[%c0_100, %c0_101] : memref<16x128xf32, #tpu.memory_space<vmem>>, vector<16x128xf32>
      tpu.vector_store %arg13[%c0_100, %c0_101], %257 {strides = array<i32>} : memref<16x128xf32, #tpu.memory_space<vmem>>, vector<16x128xf32>,
      %c0_102 = arith.constant 0 : index
      %c0_103 = arith.constant 0 : index
      %259 = vector.load %arg3[%c0_102, %c0_103] : memref<2x8xf32, #tpu.memory_space<vmem>>, vector<2x8xf32>
      %cst_104 = arith.constant 5.000000e-01 : f32
      %260 = vector.broadcast %cst_104 : f32 to vector<2x8xf32>
      %261 = arith.cmpf ogt, %259, %260 : vector<2x8xf32>
      %cst_105 = arith.constant 0xFF800000 : f32
      %cst_106 = arith.constant 0.000000e+00 : f32
      %262 = vector.broadcast %cst_105 : f32 to vector<2x8xf32>
      %263 = vector.broadcast %cst_106 : f32 to vector<2x8xf32>
      %264 = arith.select %261, %262, %263 : vector<2x8xi1>, vector<2x8xf32>
      %c0_107 = arith.constant 0 : index
      %c0_108 = arith.constant 0 : index
      %265 = vector.load %arg15[%c0_107, %c0_108] : memref<2x8xf32, #tpu.memory_space<vmem>>, vector<2x8xf32>
      tpu.vector_store %arg15[%c0_107, %c0_108], %264 {strides = array<i32>} : memref<2x8xf32, #tpu.memory_space<vmem>>, vector<2x8xf32>,
    } else {
    }
    %c0 = arith.constant 0 : index
    %c0_1 = arith.constant 0 : index
    %3 = vector.load %arg13[%c0, %c0_1] : memref<16x128xf32, #tpu.memory_space<vmem>>, vector<16x128xf32>
    %c0_2 = arith.constant 0 : index
    %c0_3 = arith.constant 0 : index
    %c0_4 = arith.constant 0 : index
    %4 = vector.load %arg10[%c0_2, %c0_3, %c0_4] : memref<1x9x128xf32, #tpu.memory_space<vmem>>, vector<1x9x128xf32>
    %5 = vector.shape_cast %4 : vector<1x9x128xf32> to vector<9x128xf32>
    %6 = vector.extract_strided_slice %5 {offsets = [0, 0], sizes = [1, 128], strides = [1, 1]} : vector<9x128xf32> to vector<1x128xf32>
    %7 = vector.extract_strided_slice %5 {offsets = [1, 0], sizes = [1, 128], strides = [1, 1]} : vector<9x128xf32> to vector<1x128xf32>
    %8 = vector.extract_strided_slice %5 {offsets = [2, 0], sizes = [1, 128], strides = [1, 1]} : vector<9x128xf32> to vector<1x128xf32>
    %9 = vector.extract_strided_slice %5 {offsets = [3, 0], sizes = [1, 128], strides = [1, 1]} : vector<9x128xf32> to vector<1x128xf32>
    %10 = vector.extract_strided_slice %5 {offsets = [4, 0], sizes = [1, 128], strides = [1, 1]} : vector<9x128xf32> to vector<1x128xf32>
    %11 = vector.extract_strided_slice %5 {offsets = [5, 0], sizes = [1, 128], strides = [1, 1]} : vector<9x128xf32> to vector<1x128xf32>
    %12 = vector.extract_strided_slice %5 {offsets = [6, 0], sizes = [1, 128], strides = [1, 1]} : vector<9x128xf32> to vector<1x128xf32>
    %13 = vector.extract_strided_slice %5 {offsets = [7, 0], sizes = [1, 128], strides = [1, 1]} : vector<9x128xf32> to vector<1x128xf32>
    %14 = vector.extract_strided_slice %5 {offsets = [8, 0], sizes = [1, 128], strides = [1, 1]} : vector<9x128xf32> to vector<1x128xf32>
    %c0_5 = arith.constant 0 : index
    %c0_6 = arith.constant 0 : index
    %c0_7 = arith.constant 0 : index
    %15 = vector.load %arg11[%c0_5, %c0_6, %c0_7] : memref<1x1x256xf32, #tpu.memory_space<vmem>>, vector<1x1x256xf32>
    %16 = vector.shape_cast %15 : vector<1x1x256xf32> to vector<1x256xf32>
    %c0_8 = arith.constant 0 : index
    %c0_9 = arith.constant 0 : index
    %c0_10 = arith.constant 0 : index
    %17 = vector.load %arg4[%c0_8, %c0_9, %c0_10] : memref<1x128x128xf32, #tpu.memory_space<vmem>>, vector<1x128x128xf32>
    %18 = vector.shape_cast %17 : vector<1x128x128xf32> to vector<128x128xf32>
    %cst = arith.constant dense<0.000000e+00> : vector<16x128xf32>
    %19 = tpu.matmul %3, %18, %cst {dimension_numbers = #tpu.dot_dimension_numbers<[1], [0], [0], [1], [0, 0, 1, 1], [], []>} : vector<16x128xf32>, vector<128x128xf32>, vector<16x128xf32> -> vector<16x128xf32>
    %20 = vector.broadcast %6 : vector<1x128xf32> to vector<16x128xf32>
    %21 = arith.addf %19, %20 : vector<16x128xf32>
    %cst_11 = arith.constant 0.176776692 : f32
    %22 = vector.broadcast %cst_11 : f32 to vector<16x128xf32>
    %23 = arith.mulf %21, %22 : vector<16x128xf32>
    %c0_12 = arith.constant 0 : index
    %c0_13 = arith.constant 0 : index
    %c0_14 = arith.constant 0 : index
    %24 = vector.load %arg5[%c0_12, %c0_13, %c0_14] : memref<1x128x128xf32, #tpu.memory_space<vmem>>, vector<1x128x128xf32>
    %25 = vector.shape_cast %24 : vector<1x128x128xf32> to vector<128x128xf32>
    %cst_15 = arith.constant dense<0.000000e+00> : vector<16x128xf32>
    %26 = tpu.matmul %3, %25, %cst_15 {dimension_numbers = #tpu.dot_dimension_numbers<[1], [0], [0], [1], [0, 0, 1, 1], [], []>} : vector<16x128xf32>, vector<128x128xf32>, vector<16x128xf32> -> vector<16x128xf32>
    %27 = vector.broadcast %7 : vector<1x128xf32> to vector<16x128xf32>
    %28 = arith.addf %26, %27 : vector<16x128xf32>
    %c0_16 = arith.constant 0 : index
    %c0_17 = arith.constant 0 : index
    %c0_18 = arith.constant 0 : index
    %29 = vector.load %arg6[%c0_16, %c0_17, %c0_18] : memref<1x128x128xf32, #tpu.memory_space<vmem>>, vector<1x128x128xf32>
    %30 = vector.shape_cast %29 : vector<1x128x128xf32> to vector<128x128xf32>
    %cst_19 = arith.constant dense<0.000000e+00> : vector<16x128xf32>
    %31 = tpu.matmul %3, %30, %cst_19 {dimension_numbers = #tpu.dot_dimension_numbers<[1], [0], [0], [1], [0, 0, 1, 1], [], []>} : vector<16x128xf32>, vector<128x128xf32>, vector<16x128xf32> -> vector<16x128xf32>
    %32 = vector.broadcast %8 : vector<1x128xf32> to vector<16x128xf32>
    %33 = arith.addf %31, %32 : vector<16x128xf32>
    %c0_20 = arith.constant 0 : index
    %c0_21 = arith.constant 0 : index
    %34 = vector.load %arg15[%c0_20, %c0_21] : memref<2x8xf32, #tpu.memory_space<vmem>>, vector<1x8xf32>
    %35 = vector.extract_strided_slice %23 {offsets = [0, 0], sizes = [8, 32], strides = [1, 1]} : vector<16x128xf32> to vector<8x32xf32>
    %36 = vector.extract_strided_slice %28 {offsets = [0, 0], sizes = [8, 32], strides = [1, 1]} : vector<16x128xf32> to vector<8x32xf32>
    %37 = vector.extract_strided_slice %33 {offsets = [0, 0], sizes = [8, 32], strides = [1, 1]} : vector<16x128xf32> to vector<8x32xf32>
    %cst_22 = arith.constant dense<0.000000e+00> : vector<8x8xf32>
    %38 = tpu.matmul %35, %36, %cst_22 {dimension_numbers = #tpu.dot_dimension_numbers<[1], [1], [0], [0], [0, 0, 1, 0], [], []>} : vector<8x32xf32>, vector<8x32xf32>, vector<8x8xf32> -> vector<8x8xf32>
    %39 = vector.broadcast %34 : vector<1x8xf32> to vector<8x8xf32>
    %40 = arith.addf %38, %39 : vector<8x8xf32>
    %cst_23 = arith.constant dense<0xFF800000> : vector<8xf32>
    %41 = vector.multi_reduction <maximumf>, %40, %cst_23 [1] : vector<8x8xf32> to vector<8xf32>
    %42 = vector.shape_cast %41 : vector<8xf32> to vector<8x1xf32>
    %43 = vector.broadcast %42 : vector<8x1xf32> to vector<8x8xf32>
    %44 = arith.subf %40, %43 : vector<8x8xf32>
    %45 = math.exp %44 : vector<8x8xf32>
    %cst_24 = arith.constant dense<0.000000e+00> : vector<8xf32>
    %46 = vector.multi_reduction <add>, %45, %cst_24 [1] : vector<8x8xf32> to vector<8xf32>
    %47 = vector.shape_cast %46 : vector<8xf32> to vector<8x1xf32>
    %48 = tpu.reciprocal %47 {approx = true} : vector<8x1xf32> -> vector<8x1xf32>
    %49 = vector.broadcast %48 : vector<8x1xf32> to vector<8x8xf32>
    %50 = arith.mulf %45, %49 : vector<8x8xf32>
    %cst_25 = arith.constant dense<0.000000e+00> : vector<8x32xf32>
    %51 = tpu.matmul %50, %37, %cst_25 {dimension_numbers = #tpu.dot_dimension_numbers<[1], [0], [0], [1], [0, 0, 1, 1], [], []>} : vector<8x8xf32>, vector<8x32xf32>, vector<8x32xf32> -> vector<8x32xf32>
    %c0_26 = arith.constant 0 : index
    %c0_27 = arith.constant 0 : index
    %52 = vector.load %arg14[%c0_26, %c0_27] : memref<16x128xf32, #tpu.memory_space<vmem>>, vector<8x32xf32>
    tpu.vector_store %arg14[%c0_26, %c0_27], %51 {strides = array<i32>} : memref<16x128xf32, #tpu.memory_space<vmem>>, vector<8x32xf32>,
    %53 = vector.extract_strided_slice %23 {offsets = [0, 32], sizes = [8, 32], strides = [1, 1]} : vector<16x128xf32> to vector<8x32xf32>
    %54 = vector.extract_strided_slice %28 {offsets = [0, 32], sizes = [8, 32], strides = [1, 1]} : vector<16x128xf32> to vector<8x32xf32>
    %55 = vector.extract_strided_slice %33 {offsets = [0, 32], sizes = [8, 32], strides = [1, 1]} : vector<16x128xf32> to vector<8x32xf32>
    %cst_28 = arith.constant dense<0.000000e+00> : vector<8x8xf32>
    %56 = tpu.matmul %53, %54, %cst_28 {dimension_numbers = #tpu.dot_dimension_numbers<[1], [1], [0], [0], [0, 0, 1, 0], [], []>} : vector<8x32xf32>, vector<8x32xf32>, vector<8x8xf32> -> vector<8x8xf32>
    %57 = vector.broadcast %34 : vector<1x8xf32> to vector<8x8xf32>
    %58 = arith.addf %56, %57 : vector<8x8xf32>
    %cst_29 = arith.constant dense<0xFF800000> : vector<8xf32>
    %59 = vector.multi_reduction <maximumf>, %58, %cst_29 [1] : vector<8x8xf32> to vector<8xf32>
    %60 = vector.shape_cast %59 : vector<8xf32> to vector<8x1xf32>
    %61 = vector.broadcast %60 : vector<8x1xf32> to vector<8x8xf32>
    %62 = arith.subf %58, %61 : vector<8x8xf32>
    %63 = math.exp %62 : vector<8x8xf32>
    %cst_30 = arith.constant dense<0.000000e+00> : vector<8xf32>
    %64 = vector.multi_reduction <add>, %63, %cst_30 [1] : vector<8x8xf32> to vector<8xf32>
    %65 = vector.shape_cast %64 : vector<8xf32> to vector<8x1xf32>
    %66 = tpu.reciprocal %65 {approx = true} : vector<8x1xf32> -> vector<8x1xf32>
    %67 = vector.broadcast %66 : vector<8x1xf32> to vector<8x8xf32>
    %68 = arith.mulf %63, %67 : vector<8x8xf32>
    %cst_31 = arith.constant dense<0.000000e+00> : vector<8x32xf32>
    %69 = tpu.matmul %68, %55, %cst_31 {dimension_numbers = #tpu.dot_dimension_numbers<[1], [0], [0], [1], [0, 0, 1, 1], [], []>} : vector<8x8xf32>, vector<8x32xf32>, vector<8x32xf32> -> vector<8x32xf32>
    %c0_32 = arith.constant 0 : index
    %c32 = arith.constant 32 : index
    %70 = vector.load %arg14[%c0_32, %c32] : memref<16x128xf32, #tpu.memory_space<vmem>>, vector<8x32xf32>
    tpu.vector_store %arg14[%c0_32, %c32], %69 {strides = array<i32>} : memref<16x128xf32, #tpu.memory_space<vmem>>, vector<8x32xf32>,
    %71 = vector.extract_strided_slice %23 {offsets = [0, 64], sizes = [8, 32], strides = [1, 1]} : vector<16x128xf32> to vector<8x32xf32>
    %72 = vector.extract_strided_slice %28 {offsets = [0, 64], sizes = [8, 32], strides = [1, 1]} : vector<16x128xf32> to vector<8x32xf32>
    %73 = vector.extract_strided_slice %33 {offsets = [0, 64], sizes = [8, 32], strides = [1, 1]} : vector<16x128xf32> to vector<8x32xf32>
    %cst_33 = arith.constant dense<0.000000e+00> : vector<8x8xf32>
    %74 = tpu.matmul %71, %72, %cst_33 {dimension_numbers = #tpu.dot_dimension_numbers<[1], [1], [0], [0], [0, 0, 1, 0], [], []>} : vector<8x32xf32>, vector<8x32xf32>, vector<8x8xf32> -> vector<8x8xf32>
    %75 = vector.broadcast %34 : vector<1x8xf32> to vector<8x8xf32>
    %76 = arith.addf %74, %75 : vector<8x8xf32>
    %cst_34 = arith.constant dense<0xFF800000> : vector<8xf32>
    %77 = vector.multi_reduction <maximumf>, %76, %cst_34 [1] : vector<8x8xf32> to vector<8xf32>
    %78 = vector.shape_cast %77 : vector<8xf32> to vector<8x1xf32>
    %79 = vector.broadcast %78 : vector<8x1xf32> to vector<8x8xf32>
    %80 = arith.subf %76, %79 : vector<8x8xf32>
    %81 = math.exp %80 : vector<8x8xf32>
    %cst_35 = arith.constant dense<0.000000e+00> : vector<8xf32>
    %82 = vector.multi_reduction <add>, %81, %cst_35 [1] : vector<8x8xf32> to vector<8xf32>
    %83 = vector.shape_cast %82 : vector<8xf32> to vector<8x1xf32>
    %84 = tpu.reciprocal %83 {approx = true} : vector<8x1xf32> -> vector<8x1xf32>
    %85 = vector.broadcast %84 : vector<8x1xf32> to vector<8x8xf32>
    %86 = arith.mulf %81, %85 : vector<8x8xf32>
    %cst_36 = arith.constant dense<0.000000e+00> : vector<8x32xf32>
    %87 = tpu.matmul %86, %73, %cst_36 {dimension_numbers = #tpu.dot_dimension_numbers<[1], [0], [0], [1], [0, 0, 1, 1], [], []>} : vector<8x8xf32>, vector<8x32xf32>, vector<8x32xf32> -> vector<8x32xf32>
    %c0_37 = arith.constant 0 : index
    %c64 = arith.constant 64 : index
    %88 = vector.load %arg14[%c0_37, %c64] : memref<16x128xf32, #tpu.memory_space<vmem>>, vector<8x32xf32>
    tpu.vector_store %arg14[%c0_37, %c64], %87 {strides = array<i32>} : memref<16x128xf32, #tpu.memory_space<vmem>>, vector<8x32xf32>,
    %89 = vector.extract_strided_slice %23 {offsets = [0, 96], sizes = [8, 32], strides = [1, 1]} : vector<16x128xf32> to vector<8x32xf32>
    %90 = vector.extract_strided_slice %28 {offsets = [0, 96], sizes = [8, 32], strides = [1, 1]} : vector<16x128xf32> to vector<8x32xf32>
    %91 = vector.extract_strided_slice %33 {offsets = [0, 96], sizes = [8, 32], strides = [1, 1]} : vector<16x128xf32> to vector<8x32xf32>
    %cst_38 = arith.constant dense<0.000000e+00> : vector<8x8xf32>
    %92 = tpu.matmul %89, %90, %cst_38 {dimension_numbers = #tpu.dot_dimension_numbers<[1], [1], [0], [0], [0, 0, 1, 0], [], []>} : vector<8x32xf32>, vector<8x32xf32>, vector<8x8xf32> -> vector<8x8xf32>
    %93 = vector.broadcast %34 : vector<1x8xf32> to vector<8x8xf32>
    %94 = arith.addf %92, %93 : vector<8x8xf32>
    %cst_39 = arith.constant dense<0xFF800000> : vector<8xf32>
    %95 = vector.multi_reduction <maximumf>, %94, %cst_39 [1] : vector<8x8xf32> to vector<8xf32>
    %96 = vector.shape_cast %95 : vector<8xf32> to vector<8x1xf32>
    %97 = vector.broadcast %96 : vector<8x1xf32> to vector<8x8xf32>
    %98 = arith.subf %94, %97 : vector<8x8xf32>
    %99 = math.exp %98 : vector<8x8xf32>
    %cst_40 = arith.constant dense<0.000000e+00> : vector<8xf32>
    %100 = vector.multi_reduction <add>, %99, %cst_40 [1] : vector<8x8xf32> to vector<8xf32>
    %101 = vector.shape_cast %100 : vector<8xf32> to vector<8x1xf32>
    %102 = tpu.reciprocal %101 {approx = true} : vector<8x1xf32> -> vector<8x1xf32>
    %103 = vector.broadcast %102 : vector<8x1xf32> to vector<8x8xf32>
    %104 = arith.mulf %99, %103 : vector<8x8xf32>
    %cst_41 = arith.constant dense<0.000000e+00> : vector<8x32xf32>
    %105 = tpu.matmul %104, %91, %cst_41 {dimension_numbers = #tpu.dot_dimension_numbers<[1], [0], [0], [1], [0, 0, 1, 1], [], []>} : vector<8x8xf32>, vector<8x32xf32>, vector<8x32xf32> -> vector<8x32xf32>
    %c0_42 = arith.constant 0 : index
    %c96 = arith.constant 96 : index
    %106 = vector.load %arg14[%c0_42, %c96] : memref<16x128xf32, #tpu.memory_space<vmem>>, vector<8x32xf32>
    tpu.vector_store %arg14[%c0_42, %c96], %105 {strides = array<i32>} : memref<16x128xf32, #tpu.memory_space<vmem>>, vector<8x32xf32>,
    %c1 = arith.constant 1 : index
    %c0_43 = arith.constant 0 : index
    %107 = vector.load %arg15[%c1, %c0_43] : memref<2x8xf32, #tpu.memory_space<vmem>>, vector<1x8xf32>
    %108 = vector.extract_strided_slice %23 {offsets = [8, 0], sizes = [8, 32], strides = [1, 1]} : vector<16x128xf32> to vector<8x32xf32>
    %109 = vector.extract_strided_slice %28 {offsets = [8, 0], sizes = [8, 32], strides = [1, 1]} : vector<16x128xf32> to vector<8x32xf32>
    %110 = vector.extract_strided_slice %33 {offsets = [8, 0], sizes = [8, 32], strides = [1, 1]} : vector<16x128xf32> to vector<8x32xf32>
    %cst_44 = arith.constant dense<0.000000e+00> : vector<8x8xf32>
    %111 = tpu.matmul %108, %109, %cst_44 {dimension_numbers = #tpu.dot_dimension_numbers<[1], [1], [0], [0], [0, 0, 1, 0], [], []>} : vector<8x32xf32>, vector<8x32xf32>, vector<8x8xf32> -> vector<8x8xf32>
    %112 = vector.broadcast %107 : vector<1x8xf32> to vector<8x8xf32>
    %113 = arith.addf %111, %112 : vector<8x8xf32>
    %cst_45 = arith.constant dense<0xFF800000> : vector<8xf32>
    %114 = vector.multi_reduction <maximumf>, %113, %cst_45 [1] : vector<8x8xf32> to vector<8xf32>
    %115 = vector.shape_cast %114 : vector<8xf32> to vector<8x1xf32>
    %116 = vector.broadcast %115 : vector<8x1xf32> to vector<8x8xf32>
    %117 = arith.subf %113, %116 : vector<8x8xf32>
    %118 = math.exp %117 : vector<8x8xf32>
    %cst_46 = arith.constant dense<0.000000e+00> : vector<8xf32>
    %119 = vector.multi_reduction <add>, %118, %cst_46 [1] : vector<8x8xf32> to vector<8xf32>
    %120 = vector.shape_cast %119 : vector<8xf32> to vector<8x1xf32>
    %121 = tpu.reciprocal %120 {approx = true} : vector<8x1xf32> -> vector<8x1xf32>
    %122 = vector.broadcast %121 : vector<8x1xf32> to vector<8x8xf32>
    %123 = arith.mulf %118, %122 : vector<8x8xf32>
    %cst_47 = arith.constant dense<0.000000e+00> : vector<8x32xf32>
    %124 = tpu.matmul %123, %110, %cst_47 {dimension_numbers = #tpu.dot_dimension_numbers<[1], [0], [0], [1], [0, 0, 1, 1], [], []>} : vector<8x8xf32>, vector<8x32xf32>, vector<8x32xf32> -> vector<8x32xf32>
    %c8 = arith.constant 8 : index
    %c0_48 = arith.constant 0 : index
    %125 = vector.load %arg14[%c8, %c0_48] : memref<16x128xf32, #tpu.memory_space<vmem>>, vector<8x32xf32>
    tpu.vector_store %arg14[%c8, %c0_48], %124 {strides = array<i32>} : memref<16x128xf32, #tpu.memory_space<vmem>>, vector<8x32xf32>,
    %126 = vector.extract_strided_slice %23 {offsets = [8, 32], sizes = [8, 32], strides = [1, 1]} : vector<16x128xf32> to vector<8x32xf32>
    %127 = vector.extract_strided_slice %28 {offsets = [8, 32], sizes = [8, 32], strides = [1, 1]} : vector<16x128xf32> to vector<8x32xf32>
    %128 = vector.extract_strided_slice %33 {offsets = [8, 32], sizes = [8, 32], strides = [1, 1]} : vector<16x128xf32> to vector<8x32xf32>
    %cst_49 = arith.constant dense<0.000000e+00> : vector<8x8xf32>
    %129 = tpu.matmul %126, %127, %cst_49 {dimension_numbers = #tpu.dot_dimension_numbers<[1], [1], [0], [0], [0, 0, 1, 0], [], []>} : vector<8x32xf32>, vector<8x32xf32>, vector<8x8xf32> -> vector<8x8xf32>
    %130 = vector.broadcast %107 : vector<1x8xf32> to vector<8x8xf32>
    %131 = arith.addf %129, %130 : vector<8x8xf32>
    %cst_50 = arith.constant dense<0xFF800000> : vector<8xf32>
    %132 = vector.multi_reduction <maximumf>, %131, %cst_50 [1] : vector<8x8xf32> to vector<8xf32>
    %133 = vector.shape_cast %132 : vector<8xf32> to vector<8x1xf32>
    %134 = vector.broadcast %133 : vector<8x1xf32> to vector<8x8xf32>
    %135 = arith.subf %131, %134 : vector<8x8xf32>
    %136 = math.exp %135 : vector<8x8xf32>
    %cst_51 = arith.constant dense<0.000000e+00> : vector<8xf32>
    %137 = vector.multi_reduction <add>, %136, %cst_51 [1] : vector<8x8xf32> to vector<8xf32>
    %138 = vector.shape_cast %137 : vector<8xf32> to vector<8x1xf32>
    %139 = tpu.reciprocal %138 {approx = true} : vector<8x1xf32> -> vector<8x1xf32>
    %140 = vector.broadcast %139 : vector<8x1xf32> to vector<8x8xf32>
    %141 = arith.mulf %136, %140 : vector<8x8xf32>
    %cst_52 = arith.constant dense<0.000000e+00> : vector<8x32xf32>
    %142 = tpu.matmul %141, %128, %cst_52 {dimension_numbers = #tpu.dot_dimension_numbers<[1], [0], [0], [1], [0, 0, 1, 1], [], []>} : vector<8x8xf32>, vector<8x32xf32>, vector<8x32xf32> -> vector<8x32xf32>
    %c8_53 = arith.constant 8 : index
    %c32_54 = arith.constant 32 : index
    %143 = vector.load %arg14[%c8_53, %c32_54] : memref<16x128xf32, #tpu.memory_space<vmem>>, vector<8x32xf32>
    tpu.vector_store %arg14[%c8_53, %c32_54], %142 {strides = array<i32>} : memref<16x128xf32, #tpu.memory_space<vmem>>, vector<8x32xf32>,
    %144 = vector.extract_strided_slice %23 {offsets = [8, 64], sizes = [8, 32], strides = [1, 1]} : vector<16x128xf32> to vector<8x32xf32>
    %145 = vector.extract_strided_slice %28 {offsets = [8, 64], sizes = [8, 32], strides = [1, 1]} : vector<16x128xf32> to vector<8x32xf32>
    %146 = vector.extract_strided_slice %33 {offsets = [8, 64], sizes = [8, 32], strides = [1, 1]} : vector<16x128xf32> to vector<8x32xf32>
    %cst_55 = arith.constant dense<0.000000e+00> : vector<8x8xf32>
    %147 = tpu.matmul %144, %145, %cst_55 {dimension_numbers = #tpu.dot_dimension_numbers<[1], [1], [0], [0], [0, 0, 1, 0], [], []>} : vector<8x32xf32>, vector<8x32xf32>, vector<8x8xf32> -> vector<8x8xf32>
    %148 = vector.broadcast %107 : vector<1x8xf32> to vector<8x8xf32>
    %149 = arith.addf %147, %148 : vector<8x8xf32>
    %cst_56 = arith.constant dense<0xFF800000> : vector<8xf32>
    %150 = vector.multi_reduction <maximumf>, %149, %cst_56 [1] : vector<8x8xf32> to vector<8xf32>
    %151 = vector.shape_cast %150 : vector<8xf32> to vector<8x1xf32>
    %152 = vector.broadcast %151 : vector<8x1xf32> to vector<8x8xf32>
    %153 = arith.subf %149, %152 : vector<8x8xf32>
    %154 = math.exp %153 : vector<8x8xf32>
    %cst_57 = arith.constant dense<0.000000e+00> : vector<8xf32>
    %155 = vector.multi_reduction <add>, %154, %cst_57 [1] : vector<8x8xf32> to vector<8xf32>
    %156 = vector.shape_cast %155 : vector<8xf32> to vector<8x1xf32>
    %157 = tpu.reciprocal %156 {approx = true} : vector<8x1xf32> -> vector<8x1xf32>
    %158 = vector.broadcast %157 : vector<8x1xf32> to vector<8x8xf32>
    %159 = arith.mulf %154, %158 : vector<8x8xf32>
    %cst_58 = arith.constant dense<0.000000e+00> : vector<8x32xf32>
    %160 = tpu.matmul %159, %146, %cst_58 {dimension_numbers = #tpu.dot_dimension_numbers<[1], [0], [0], [1], [0, 0, 1, 1], [], []>} : vector<8x8xf32>, vector<8x32xf32>, vector<8x32xf32> -> vector<8x32xf32>
    %c8_59 = arith.constant 8 : index
    %c64_60 = arith.constant 64 : index
    %161 = vector.load %arg14[%c8_59, %c64_60] : memref<16x128xf32, #tpu.memory_space<vmem>>, vector<8x32xf32>
    tpu.vector_store %arg14[%c8_59, %c64_60], %160 {strides = array<i32>} : memref<16x128xf32, #tpu.memory_space<vmem>>, vector<8x32xf32>,
    %162 = vector.extract_strided_slice %23 {offsets = [8, 96], sizes = [8, 32], strides = [1, 1]} : vector<16x128xf32> to vector<8x32xf32>
    %163 = vector.extract_strided_slice %28 {offsets = [8, 96], sizes = [8, 32], strides = [1, 1]} : vector<16x128xf32> to vector<8x32xf32>
    %164 = vector.extract_strided_slice %33 {offsets = [8, 96], sizes = [8, 32], strides = [1, 1]} : vector<16x128xf32> to vector<8x32xf32>
    %cst_61 = arith.constant dense<0.000000e+00> : vector<8x8xf32>
    %165 = tpu.matmul %162, %163, %cst_61 {dimension_numbers = #tpu.dot_dimension_numbers<[1], [1], [0], [0], [0, 0, 1, 0], [], []>} : vector<8x32xf32>, vector<8x32xf32>, vector<8x8xf32> -> vector<8x8xf32>
    %166 = vector.broadcast %107 : vector<1x8xf32> to vector<8x8xf32>
    %167 = arith.addf %165, %166 : vector<8x8xf32>
    %cst_62 = arith.constant dense<0xFF800000> : vector<8xf32>
    %168 = vector.multi_reduction <maximumf>, %167, %cst_62 [1] : vector<8x8xf32> to vector<8xf32>
    %169 = vector.shape_cast %168 : vector<8xf32> to vector<8x1xf32>
    %170 = vector.broadcast %169 : vector<8x1xf32> to vector<8x8xf32>
    %171 = arith.subf %167, %170 : vector<8x8xf32>
    %172 = math.exp %171 : vector<8x8xf32>
    %cst_63 = arith.constant dense<0.000000e+00> : vector<8xf32>
    %173 = vector.multi_reduction <add>, %172, %cst_63 [1] : vector<8x8xf32> to vector<8xf32>
    %174 = vector.shape_cast %173 : vector<8xf32> to vector<8x1xf32>
    %175 = tpu.reciprocal %174 {approx = true} : vector<8x1xf32> -> vector<8x1xf32>
    %176 = vector.broadcast %175 : vector<8x1xf32> to vector<8x8xf32>
    %177 = arith.mulf %172, %176 : vector<8x8xf32>
    %cst_64 = arith.constant dense<0.000000e+00> : vector<8x32xf32>
    %178 = tpu.matmul %177, %164, %cst_64 {dimension_numbers = #tpu.dot_dimension_numbers<[1], [0], [0], [1], [0, 0, 1, 1], [], []>} : vector<8x8xf32>, vector<8x32xf32>, vector<8x32xf32> -> vector<8x32xf32>
    %c8_65 = arith.constant 8 : index
    %c96_66 = arith.constant 96 : index
    %179 = vector.load %arg14[%c8_65, %c96_66] : memref<16x128xf32, #tpu.memory_space<vmem>>, vector<8x32xf32>
    tpu.vector_store %arg14[%c8_65, %c96_66], %178 {strides = array<i32>} : memref<16x128xf32, #tpu.memory_space<vmem>>, vector<8x32xf32>,
    %c0_67 = arith.constant 0 : index
    %c0_68 = arith.constant 0 : index
    %180 = vector.load %arg14[%c0_67, %c0_68] : memref<16x128xf32, #tpu.memory_space<vmem>>, vector<16x128xf32>
    %c0_69 = arith.constant 0 : index
    %c0_70 = arith.constant 0 : index
    %c0_71 = arith.constant 0 : index
    %181 = vector.load %arg7[%c0_69, %c0_70, %c0_71] : memref<1x128x128xf32, #tpu.memory_space<vmem>>, vector<1x128x128xf32>
    %182 = vector.shape_cast %181 : vector<1x128x128xf32> to vector<128x128xf32>
    %cst_72 = arith.constant dense<0.000000e+00> : vector<16x128xf32>
    %183 = tpu.matmul %180, %182, %cst_72 {dimension_numbers = #tpu.dot_dimension_numbers<[1], [0], [0], [1], [0, 0, 1, 1], [], []>} : vector<16x128xf32>, vector<128x128xf32>, vector<16x128xf32> -> vector<16x128xf32>
    %184 = vector.broadcast %9 : vector<1x128xf32> to vector<16x128xf32>
    %185 = arith.addf %183, %184 : vector<16x128xf32>
    %186 = arith.cmpf one, %185, %185 : vector<16x128xf32>
    %cst_73 = arith.constant 0.000000e+00 : f32
    %187 = vector.broadcast %cst_73 : f32 to vector<16x128xf32>
    %188 = arith.select %186, %187, %185 : vector<16x128xi1>, vector<16x128xf32>
    %189 = arith.addf %3, %188 : vector<16x128xf32>
    %cst_74 = arith.constant dense<0.000000e+00> : vector<16xf32>
    %190 = vector.multi_reduction <add>, %189, %cst_74 [1] : vector<16x128xf32> to vector<16xf32>
    %191 = vector.shape_cast %190 : vector<16xf32> to vector<16x1xf32>
    %cst_75 = arith.constant 1.280000e+02 : f32
    %192 = vector.broadcast %cst_75 : f32 to vector<16x1xf32>
    %193 = arith.divf %191, %192 : vector<16x1xf32>
    %194 = vector.broadcast %193 : vector<16x1xf32> to vector<16x128xf32>
    %195 = arith.subf %189, %194 : vector<16x128xf32>
    %196 = arith.mulf %195, %195 : vector<16x128xf32>
    %cst_76 = arith.constant dense<0.000000e+00> : vector<16xf32>
    %197 = vector.multi_reduction <add>, %196, %cst_76 [1] : vector<16x128xf32> to vector<16xf32>
    %198 = vector.shape_cast %197 : vector<16xf32> to vector<16x1xf32>
    %cst_77 = arith.constant 1.280000e+02 : f32
    %199 = vector.broadcast %cst_77 : f32 to vector<16x1xf32>
    %200 = arith.divf %198, %199 : vector<16x1xf32>
    %201 = vector.broadcast %193 : vector<16x1xf32> to vector<16x128xf32>
    %202 = arith.subf %189, %201 : vector<16x128xf32>
    %cst_78 = arith.constant 9.99999974E-6 : f32
    %203 = vector.broadcast %cst_78 : f32 to vector<16x1xf32>
    %204 = arith.addf %200, %203 : vector<16x1xf32>
    %205 = math.rsqrt %204 : vector<16x1xf32>
    %206 = vector.broadcast %205 : vector<16x1xf32> to vector<16x128xf32>
    %207 = arith.mulf %202, %206 : vector<16x128xf32>
    %208 = vector.broadcast %10 : vector<1x128xf32> to vector<16x128xf32>
    %209 = arith.mulf %207, %208 : vector<16x128xf32>
    %210 = vector.broadcast %11 : vector<1x128xf32> to vector<16x128xf32>
    %211 = arith.addf %209, %210 : vector<16x128xf32>
    %c0_79 = arith.constant 0 : index
    %c0_80 = arith.constant 0 : index
    %c0_81 = arith.constant 0 : index
    %212 = vector.load %arg8[%c0_79, %c0_80, %c0_81] : memref<1x128x256xf32, #tpu.memory_space<vmem>>, vector<1x128x256xf32>
    %213 = vector.shape_cast %212 : vector<1x128x256xf32> to vector<128x256xf32>
    %cst_82 = arith.constant dense<0.000000e+00> : vector<16x256xf32>
    %214 = tpu.matmul %211, %213, %cst_82 {dimension_numbers = #tpu.dot_dimension_numbers<[1], [0], [0], [1], [0, 0, 1, 1], [], []>} : vector<16x128xf32>, vector<128x256xf32>, vector<16x256xf32> -> vector<16x256xf32>
    %215 = vector.broadcast %16 : vector<1x256xf32> to vector<16x256xf32>
    %216 = arith.addf %214, %215 : vector<16x256xf32>
    %cst_83 = arith.constant 5.000000e-01 : f32
    %217 = vector.broadcast %cst_83 : f32 to vector<16x256xf32>
    %218 = arith.mulf %217, %216 : vector<16x256xf32>
    %cst_84 = arith.constant 0.707106769 : f32
    %219 = vector.broadcast %cst_84 : f32 to vector<16x256xf32>
    %220 = arith.mulf %216, %219 : vector<16x256xf32>
    %221 = math.erf %220 : vector<16x256xf32>
    %cst_85 = arith.constant 1.000000e+00 : f32
    %222 = vector.broadcast %cst_85 : f32 to vector<16x256xf32>
    %223 = arith.addf %222, %221 : vector<16x256xf32>
    %224 = arith.mulf %218, %223 : vector<16x256xf32>
    %c0_86 = arith.constant 0 : index
    %c0_87 = arith.constant 0 : index
    %c0_88 = arith.constant 0 : index
    %225 = vector.load %arg9[%c0_86, %c0_87, %c0_88] : memref<1x256x128xf32, #tpu.memory_space<vmem>>, vector<1x256x128xf32>
    %226 = vector.shape_cast %225 : vector<1x256x128xf32> to vector<256x128xf32>
    %cst_89 = arith.constant dense<0.000000e+00> : vector<16x128xf32>
    %227 = tpu.matmul %224, %226, %cst_89 {dimension_numbers = #tpu.dot_dimension_numbers<[1], [0], [0], [1], [0, 0, 1, 1], [], []>} : vector<16x256xf32>, vector<256x128xf32>, vector<16x128xf32> -> vector<16x128xf32>
    %228 = vector.broadcast %12 : vector<1x128xf32> to vector<16x128xf32>
    %229 = arith.addf %227, %228 : vector<16x128xf32>
    %230 = arith.addf %229, %211 : vector<16x128xf32>
    %cst_90 = arith.constant dense<0.000000e+00> : vector<16xf32>
    %231 = vector.multi_reduction <add>, %230, %cst_90 [1] : vector<16x128xf32> to vector<16xf32>
    %232 = vector.shape_cast %231 : vector<16xf32> to vector<16x1xf32>
    %cst_91 = arith.constant 1.280000e+02 : f32
    %233 = vector.broadcast %cst_91 : f32 to vector<16x1xf32>
    %234 = arith.divf %232, %233 : vector<16x1xf32>
    %235 = vector.broadcast %234 : vector<16x1xf32> to vector<16x128xf32>
    %236 = arith.subf %230, %235 : vector<16x128xf32>
    %237 = arith.mulf %236, %236 : vector<16x128xf32>
    %cst_92 = arith.constant dense<0.000000e+00> : vector<16xf32>
    %238 = vector.multi_reduction <add>, %237, %cst_92 [1] : vector<16x128xf32> to vector<16xf32>
    %239 = vector.shape_cast %238 : vector<16xf32> to vector<16x1xf32>
    %cst_93 = arith.constant 1.280000e+02 : f32
    %240 = vector.broadcast %cst_93 : f32 to vector<16x1xf32>
    %241 = arith.divf %239, %240 : vector<16x1xf32>
    %242 = vector.broadcast %234 : vector<16x1xf32> to vector<16x128xf32>
    %243 = arith.subf %230, %242 : vector<16x128xf32>
    %cst_94 = arith.constant 9.99999974E-6 : f32
    %244 = vector.broadcast %cst_94 : f32 to vector<16x1xf32>
    %245 = arith.addf %241, %244 : vector<16x1xf32>
    %246 = math.rsqrt %245 : vector<16x1xf32>
    %247 = vector.broadcast %246 : vector<16x1xf32> to vector<16x128xf32>
    %248 = arith.mulf %243, %247 : vector<16x128xf32>
    %249 = vector.broadcast %13 : vector<1x128xf32> to vector<16x128xf32>
    %250 = arith.mulf %248, %249 : vector<16x128xf32>
    %251 = vector.broadcast %14 : vector<1x128xf32> to vector<16x128xf32>
    %252 = arith.addf %250, %251 : vector<16x128xf32>
    %c0_95 = arith.constant 0 : index
    %c0_96 = arith.constant 0 : index
    %253 = vector.load %arg13[%c0_95, %c0_96] : memref<16x128xf32, #tpu.memory_space<vmem>>, vector<16x128xf32>
    tpu.vector_store %arg13[%c0_95, %c0_96], %252 {strides = array<i32>} : memref<16x128xf32, #tpu.memory_space<vmem>>, vector<16x128xf32>,
    %c1_i32 = arith.constant 1 : i32
    %254 = arith.cmpi eq, %arg1, %c1_i32 : i32
    %255 = arith.extui %254 : i1 to i32
    %c0_i32_97 = arith.constant 0 : i32
    %256 = arith.cmpi ne, %255, %c0_i32_97 : i32
    scf.if %256 {
      %c0_98 = arith.constant 0 : index
      %c0_99 = arith.constant 0 : index
      %257 = vector.load %arg12[%c0_98, %c0_99] : memref<16x128xf32, #tpu.memory_space<vmem>>, vector<16x128xf32>
      tpu.vector_store %arg12[%c0_98, %c0_99], %252 {strides = array<i32>} : memref<16x128xf32, #tpu.memory_space<vmem>>, vector<16x128xf32>,
    } else {
    }
    return
  }
  func.func @transform_0(%arg0: i32, %arg1: i32) -> (i32, i32) {
    %c0_i32 = arith.constant 0 : i32
    %c0_i32_0 = arith.constant 0 : i32
    return %arg0, %c0_i32 : i32, i32
  }
  func.func @transform_1(%arg0: i32, %arg1: i32) -> (i32, i32) {
    %c0_i32 = arith.constant 0 : i32
    %c0_i32_0 = arith.constant 0 : i32
    return %arg0, %c0_i32 : i32, i32
  }
  func.func @transform_2(%arg0: i32, %arg1: i32) -> (i32, i32, i32) {
    %c0_i32 = arith.constant 0 : i32
    %c0_i32_0 = arith.constant 0 : i32
    %c0_i32_1 = arith.constant 0 : i32
    return %arg1, %c0_i32, %c0_i32_0 : i32, i32, i32
  }
  func.func @transform_3(%arg0: i32, %arg1: i32) -> (i32, i32, i32) {
    %c0_i32 = arith.constant 0 : i32
    %c0_i32_0 = arith.constant 0 : i32
    %c0_i32_1 = arith.constant 0 : i32
    return %arg1, %c0_i32, %c0_i32_0 : i32, i32, i32
  }
  func.func @transform_4(%arg0: i32, %arg1: i32) -> (i32, i32, i32) {
    %c0_i32 = arith.constant 0 : i32
    %c0_i32_0 = arith.constant 0 : i32
    %c0_i32_1 = arith.constant 0 : i32
    return %arg1, %c0_i32, %c0_i32_0 : i32, i32, i32
  }
  func.func @transform_5(%arg0: i32, %arg1: i32) -> (i32, i32, i32) {
    %c0_i32 = arith.constant 0 : i32
    %c0_i32_0 = arith.constant 0 : i32
    %c0_i32_1 = arith.constant 0 : i32
    return %arg1, %c0_i32, %c0_i32_0 : i32, i32, i32
  }
  func.func @transform_6(%arg0: i32, %arg1: i32) -> (i32, i32, i32) {
    %c0_i32 = arith.constant 0 : i32
    %c0_i32_0 = arith.constant 0 : i32
    %c0_i32_1 = arith.constant 0 : i32
    return %arg1, %c0_i32, %c0_i32_0 : i32, i32, i32
  }
  func.func @transform_7(%arg0: i32, %arg1: i32) -> (i32, i32, i32) {
    %c0_i32 = arith.constant 0 : i32
    %c0_i32_0 = arith.constant 0 : i32
    %c0_i32_1 = arith.constant 0 : i32
    return %arg1, %c0_i32, %c0_i32_0 : i32, i32, i32
  }
  func.func @transform_8(%arg0: i32, %arg1: i32) -> (i32, i32, i32) {
    %c0_i32 = arith.constant 0 : i32
    %c0_i32_0 = arith.constant 0 : i32
    %c0_i32_1 = arith.constant 0 : i32
    return %arg1, %c0_i32, %c0_i32_0 : i32, i32, i32
  }
  func.func @transform_9(%arg0: i32, %arg1: i32) -> (i32, i32, i32) {
    %c0_i32 = arith.constant 0 : i32
    %c0_i32_0 = arith.constant 0 : i32
    %c0_i32_1 = arith.constant 0 : i32
    return %arg1, %c0_i32, %c0_i32_0 : i32, i32, i32
  }
  func.func @transform_10(%arg0: i32, %arg1: i32) -> (i32, i32) {
    %c0_i32 = arith.constant 0 : i32
    %c0_i32_0 = arith.constant 0 : i32
    return %arg0, %c0_i32 : i32, i32
  }
}

</mosaic_0001>

<bundles_post_ra>
// kernel: tpu_custom_call.1
= control target key start
LH: loop header
LB: loop body
LE: loop exit
PB: predicated region body
PF: predicated region fallthrough
CT: control target
= control target key end

     0   :  { %s4869_s0 = inlined_call_operand.vmem [shape: f32[16,128], index: 0, kind: input, shape index: {}]   ;;  %s4870_s1 = inlined_call_operand.vmem [shape: f32[2,8], index: 1, kind: input, shape index: {}]   ;;  %s4871_s2 = inlined_call_operand.hbm [shape: f32[2,128,128], index: 2, kind: input, shape index: {}]   ;;  %s4872_s3 = inlined_call_operand.hbm [shape: f32[2,128,128], index: 3, kind: input, shape index: {}]   ;;  %s4873_s4 = inlined_call_operand.hbm [shape: f32[2,128,128], index: 4, kind: input, shape index: {}]   ;;  %s4874_s5 = inlined_call_operand.hbm [shape: f32[2,128,128], index: 5, kind: input, shape index: {}]   ;;  %s4875_s6 = inlined_call_operand.hbm [shape: f32[2,128,256], index: 6, kind: input, shape index: {}]   ;;  %s4876_s7 = inlined_call_operand.hbm [shape: f32[2,256,128], index: 7, kind: input, shape index: {}]   ;;  %s4877_s8 = inlined_call_operand.vmem [shape: f32[2,9,128], index: 8, kind: input, shape index: {}]   ;;  %s4878_s9 = inlined_call_operand.vmem [shape: f32[2,1,256], index: 9, kind: input, shape index: {}]   ;;  %s4879_s10 = inlined_call_operand.hbm [shape: f32[16,128], index: 10, kind: output, shape index: {}]  }
   0x1   :  { %4892 = sst [smem:[#allocation27_spill]] %s4869_s0 }
   0x2   :  { %4893 = sst [smem:[#allocation28_spill]] %s4870_s1 }
   0x3   :  { %4894 = sst [smem:[#allocation29_spill]] %s4872_s3 }
   0x4   :  { %4895 = sst [smem:[#allocation30_spill]] %s4874_s5 }
   0x5   :  { %4896 = sst [smem:[#allocation31_spill]] %s4877_s8 }
   0x6   :  { %4897 = sst [smem:[#allocation32_spill]] %s4878_s9 }
   0x7   :  { %4898 = sst [smem:[#allocation33_spill]] %s4879_s10 }
   0x8   :  { %15 = vsyncpa [#allocation6], 0 }
   0x9   :  { %17 = vsyncpa [#allocation6 + $0x1], 0 }
   0xa   :  { %18 = vsyncpa [#allocation9], 0 }
   0xb   :  { %20 = vsyncpa [#allocation9 + $0x1], 0 }
   0xc   :  { %21 = vsyncpa [#allocation12], 0 }
   0xd   :  { %23 = vsyncpa [#allocation12 + $0x1], 0 }
   0xe   :  { %24 = vsyncpa [#allocation15], 0 }
   0xf   :  { %26 = vsyncpa [#allocation15 + $0x1], 0 }
  0x10   :  { %27 = vsyncpa [#allocation7], 0  ;;  %s4110_s13 = smov 0   ;;  %s4112_s14 = smov 0  }
  0x11   :  { %s4114_s15 = smov 0   ;;  %s4116_s16 = smov 0  }
  0x12   :  { %s4118_s17 = smov 0   ;;  %s4120_s18 = smov 0  }
  0x13 LB: > { %4899 = sst [smem:[#allocation22_spill]] %s4022_s15  ;;  %s4139_s19 = sadd.s32 4294967295, %s4034_s18   ;;  %s4034_s18 = sphi %s4120_s18, %s33_s18   ;;  %s4030_s17 = sphi %s4118_s17, %s4930_s17   ;;  %s4026_s16 = sphi %s4116_s16, %s4929_s16   ;;  %s4022_s15 = sphi %s4114_s15, %s4925_s15   ;;  %s4018_s14 = sphi %s4112_s14, %s4928_s14   ;;  %s4014_s13 = sphi %s4110_s13, %s4927_s13  }
  0x14   : > { %4900 = sst [smem:[#allocation23_spill]] %s4026_s16  ;;  %s42_s20 = sadd.s32 1, %s4030_s17 }
  0x15   : > { %4901 = sst [smem:[#allocation24_spill]] %s4034_s18  ;;  %p43_p0 = scmp.ge.s32.totalorder %s42_s20, 2 }
  0x16   : > { %s104_s21 = sadd.s32 1, %s4022_s15  ;;  %p111_p1 = scmp.ne.s32.totalorder %s4022_s15, %s4018_s14 }
  0x17   : > { %p112_p2 = scmp.eq.s32.totalorder %s4034_s18, 0  ;;  %s4932_s20 = smov (%p43_p0, %s42_s20), 0 }
  0x18   : > { %4902 = sst [smem:[#allocation25_spill]] %s4932_s20  ;;  %p117_p4 = scmp.ne.s32.totalorder %s4018_s14, %s4014_s13 }
  0x19   : > { %p113_p3 = por %p112_p2, %p111_p1  ;;  %s101_s22 = ssub.s32 %s4030_s17, %s4932_s20 }
  0x1a   : > { %p118_p5 = scmp.eq.s32.totalorder %s4139_s19, 0  ;;  %p102_p6 = scmp.eq.s32.totalorder %s101_s22, 0 }
  0x1b   : > { %p3649_p8 = scmp.lt.s32.totalorder %s4034_s18, 2  ;;  %s4161_s25 = sand.u32 1, %s4022_s15  }
  0x1c   : > { %p4152_p7 = por %p118_p5, %p117_p4  ;;  %s4164_s26 = sshll.u32 %s4030_s17, 11 }
  0x1d   : > { %s4158_s24 = scalar_select %p102_p6, %s4022_s15, %s104_s21  }
  0x1e   : > { %s4903_s23 = scalar_select %p4152_p7, 1, 0 }
  0x1f   : > { %4904 = sst [smem:[#allocation26_spill]] %s4158_s24  ;;  %s4167_s27 = sshll.u32 %s4161_s25, 7 }
  0x20   : > { %p4169_p9 = pnand %p3649_p8, %p113_p3  ;;  %s4883_s29 = sand.u32 1, %s4034_s18  }
  0x21   : > { %s4906_s3 = sld [smem:[#allocation29_spill]]  ;;  %s390_s13 = scalar_lea.vmem [#allocation8], %s4167_s27 }
  0x22   : > { %s397_s21 = sshll.u32 %s390_s13, 4  ;;  %s4186_s22 = scalar_lea.sflag [#allocation9], %s4883_s29  ;;  %s4181_s21 = int_to_ptr.vmem [resolvable:$true] %s397_s21 }
  0x23   : > { %p4192_p12 = pneg %p4169_p9 }
  0x27   : > { %s4178_s12 = scalar_lea.hbm %s4906_s3, %s4164_s26  ;;  %s3767_s13 = scalar_lea.hbm %s4906_s3, 4096 }
  0x28   : > { %s3762_s20 = scalar_lea.hbm %s4178_s12, 2048  ;;  %p3768_p1 = scmp.lt.u32.totalorder %s4178_s12, %s4906_s3 }
  0x29   : > { %p3763_p11 = scmp.ne.s32.totalorder %s4178_s12, %s3762_s20  ;;  %p3769_p2 = scmp.lt.u32.totalorder %s3767_s13, %s3762_s20 }
  0x2a   : > { %p3771_p4 = scmp.lt.u32.totalorder %s3762_s20, %s4178_s12 }
  0x2b   : > { %p3765_p13 = pnand %p4192_p12, %p3763_p11  ;;  %p3770_p3 = por %p3769_p2, %p3768_p1 }
  0x2d   : > { %p3766_p0 = pneg %p3765_p13  ;;  %p3772_p5 = por %p3771_p4, %p3770_p3 }
  0x2f   : > { %p3773_p6 = pnand %p3772_p5, %p3766_p0 }
  0x31   : > { %3776 = shalt.err (!%p3773_p6)
}
  0x32   : > { %s3777_s29 = scalar_lea.vmem %s4181_s21, 2048  ;;  %s4036_s30 = smov [#allocation8]  }
  0x33   : > { %p3778_p8 = scmp.ne.s32.totalorder %s4181_s21, %s3777_s29  ;;  %s3782_s11 = sshll.u32 %s4036_s30, 4  ;;  %s3783_s11 = int_to_ptr.vmem [resolvable:$false] %s3782_s11 }
  0x34   : > { %s3784_s10 = scalar_lea.vmem %s3783_s11, 4096  ;;  %p3785_p10 = scmp.lt.s32.totalorder %s4181_s21, %s3783_s11 }
  0x35   : > { %p3780_p11 = pnand %p3778_p8, %p4192_p12  ;;  %p3786_p7 = scmp.lt.s32.totalorder %s3784_s10, %s3777_s29 }
  0x37   : > { %p3781_p13 = pneg %p3780_p11  ;;  %p3787_p1 = por %p3786_p7, %p3785_p10 }
  0x39   : > { %p3788_p2 = pnand %p3787_p1, %p3781_p13 }
  0x3b   : > { %3791 = shalt.err (!%p3788_p2)
}
  0x3c   : > { %s4885_s15 = smov 128   ;;  %s4887_s20 = smov 8  }
  0x3d   : > { %3636 = dma.hbm_to_vmem [thread:$0]  (!%p4169_p9), %s4178_s12, 2048, %s4181_s21, %s4186_s22, %s4885_s15, %s4885_s15, %s4887_s20  }
  0x3e   : > { %p504_p7 = scmp.lt.s32.totalorder %s4034_s18, 3  ;;  %s4908_s5 = sld [smem:[#allocation30_spill]] }
  0x3f   : > { %p4909_p10 = scmp.ge.s32.totalorder %s4034_s18, 1  ;;  %s432_s10 = scalar_lea.vmem [#allocation11], %s4167_s27 }
  0x40   : > { %s439_s3 = sshll.u32 %s432_s10, 4  ;;  %s4911_s12 = sand.u32 1, %s4034_s18   ;;  %s4233_s3 = int_to_ptr.vmem [resolvable:$true] %s439_s3 }
  0x41   : > { %p4228_p0 = pnand %p4909_p10, %p504_p7  ;;  %s4237_s21 = scalar_lea.sflag [#allocation12], %s4911_s12 }
  0x43   : > { %s4910_s11 = scalar_select %p4228_p0, 1, 0 }
  0x44   : > { %s4224_s30 = scalar_lea.hbm %s4908_s5, %s4164_s26  ;;  %s3797_s20 = scalar_lea.hbm %s4908_s5, 4096 }
  0x45   : > { %s3792_s15 = scalar_lea.hbm %s4224_s30, 2048  ;;  %p3798_p6 = scmp.lt.u32.totalorder %s4224_s30, %s4908_s5 }
  0x46   : > { %p3793_p3 = scmp.ne.s32.totalorder %s4224_s30, %s3792_s15  ;;  %p3799_p8 = scmp.lt.u32.totalorder %s3797_s20, %s3792_s15 }
  0x47   : > { %p3801_p13 = scmp.lt.u32.totalorder %s3792_s15, %s4224_s30 }
  0x48   : > { %p3795_p4 = pnand %p3793_p3, %p4192_p12  ;;  %p3800_p11 = por %p3799_p8, %p3798_p6 }
  0x4a   : > { %p3796_p5 = pneg %p3795_p4  ;;  %p3802_p1 = por %p3801_p13, %p3800_p11 }
  0x4c   : > { %p3803_p2 = pnand %p3802_p1, %p3796_p5 }
  0x4e   : > { %3806 = shalt.err (!%p3803_p2)
}
  0x4f   : > { %s3807_s10 = scalar_lea.vmem %s4233_s3, 2048  ;;  %s4039_s12 = smov [#allocation11]  }
  0x50   : > { %p3808_p7 = scmp.ne.s32.totalorder %s4233_s3, %s3807_s10  ;;  %s3812_s29 = sshll.u32 %s4039_s12, 4  ;;  %s3813_s29 = int_to_ptr.vmem [resolvable:$false] %s3812_s29 }
  0x51   : > { %s3814_s0 = scalar_lea.vmem %s3813_s29, 4096  ;;  %p3815_p4 = scmp.lt.s32.totalorder %s4233_s3, %s3813_s29 }
  0x52   : > { %p3810_p10 = pnand %p3808_p7, %p4192_p12  ;;  %p3816_p0 = scmp.lt.s32.totalorder %s3814_s0, %s3807_s10 }
  0x54   : > { %p3811_p3 = pneg %p3810_p10  ;;  %p3817_p6 = por %p3816_p0, %p3815_p4 }
  0x56   : > { %p3818_p8 = pnand %p3817_p6, %p3811_p3 }
  0x58   : > { %3821 = shalt.err (!%p3818_p8)
}
  0x59   : > { %s4912_s1 = smov 8   ;;  %s4913_s15 = smov 128  }
  0x5a   : > { %3642 = dma.hbm_to_vmem [thread:$0]  (!%p4169_p9), %s4224_s30, 2048, %s4233_s3, %s4237_s21, %s4913_s15, %s4913_s15, %s4912_s1  }
  0x5b   : > { %s4268_s10 = scalar_lea.hbm %s4871_s2, %s4164_s26  ;;  %s369_s12 = scalar_lea.vmem [#allocation5], %s4167_s27 }
  0x5c   : > { %s376_s29 = sshll.u32 %s369_s12, 4  ;;  %s4277_s18 = scalar_lea.hbm %s4873_s4, %s4164_s26  ;;  %s4271_s29 = int_to_ptr.vmem [resolvable:$true] %s376_s29 }
  0x5d   : > { %s366_s9 = scalar_lea.sflag [#allocation6], %s4161_s25  ;;  %s3822_s3 = scalar_lea.hbm %s4268_s10, 2048 }
  0x5e   : > { %p3823_p0 = scmp.ne.s32.totalorder %s4268_s10, %s3822_s3  ;;  %s3827_s13 = scalar_lea.hbm %s4871_s2, 4096 }
  0x5f   : > { %p3828_p13 = scmp.lt.u32.totalorder %s4268_s10, %s4871_s2  ;;  %p3829_p1 = scmp.lt.u32.totalorder %s3827_s13, %s3822_s3 }
  0x60   : > { %p3825_p5 = pnand %p3823_p0, %p4192_p12  ;;  %p3831_p7 = scmp.lt.u32.totalorder %s3822_s3, %s4268_s10 }
  0x61   : > { %p3830_p2 = por %p3829_p1, %p3828_p13 }
  0x62   : > { %p3826_p11 = pneg %p3825_p5 }
  0x63   : > { %p3832_p10 = por %p3831_p7, %p3830_p2 }
  0x65   : > { %p3833_p3 = pnand %p3832_p10, %p3826_p11 }
  0x67   : > { %3836 = shalt.err (!%p3833_p3)
}
  0x68   : > { %s3837_s5 = scalar_lea.vmem %s4271_s29, 2048  ;;  %s4040_s26 = smov [#allocation5]  }
  0x69   : > { %p3838_p4 = scmp.ne.s32.totalorder %s4271_s29, %s3837_s5  ;;  %s3842_s12 = sshll.u32 %s4040_s26, 4  ;;  %s3843_s12 = int_to_ptr.vmem [resolvable:$false] %s3842_s12 }
  0x6a   : > { %s3844_s8 = scalar_lea.vmem %s3843_s12, 4096  ;;  %p3845_p0 = scmp.lt.s32.totalorder %s4271_s29, %s3843_s12 }
  0x6b   : > { %p3840_p6 = pnand %p3838_p4, %p4192_p12  ;;  %p3846_p5 = scmp.lt.s32.totalorder %s3844_s8, %s3837_s5 }
  0x6d   : > { %p3841_p8 = pneg %p3840_p6  ;;  %p3847_p13 = por %p3846_p5, %p3845_p0 }
  0x6f   : > { %p3848_p1 = pnand %p3847_p13, %p3841_p8 }
  0x71   : > { %3851 = shalt.err (!%p3848_p1)
}
  0x72   : > { %3633 = dma.hbm_to_vmem [thread:$0]  (!%p4169_p9), %s4268_s10, 2048, %s4271_s29, %s366_s9, %s4913_s15, %s4913_s15, %s4912_s1  }
  0x73   : > { %s411_s16 = scalar_lea.vmem [#allocation10], %s4167_s27  ;;  %s3004_s3 = sshll.u32 %s4161_s25, 8 }
  0x74   : > { %s418_s0 = sshll.u32 %s411_s16, 4  ;;  %s3852_s30 = scalar_lea.hbm %s4277_s18, 2048  ;;  %s4308_s0 = int_to_ptr.vmem [resolvable:$true] %s418_s0 }
  0x75   : > { %p3853_p11 = scmp.ne.s32.totalorder %s4277_s18, %s3852_s30  ;;  %s3857_s5 = scalar_lea.hbm %s4873_s4, 4096 }
  0x76   : > { %p3858_p10 = scmp.lt.u32.totalorder %s4277_s18, %s4873_s4  ;;  %p3859_p3 = scmp.lt.u32.totalorder %s3857_s5, %s3852_s30 }
  0x77   : > { %p3855_p2 = pnand %p3853_p11, %p4192_p12  ;;  %p3861_p6 = scmp.lt.u32.totalorder %s3852_s30, %s4277_s18 }
  0x78   : > { %p3860_p4 = por %p3859_p3, %p3858_p10 }
  0x79   : > { %p3856_p7 = pneg %p3855_p2 }
  0x7a   : > { %p3862_p8 = por %p3861_p6, %p3860_p4 }
  0x7c   : > { %p3863_p0 = pnand %p3862_p8, %p3856_p7 }
  0x7e   : > { %3866 = shalt.err (!%p3863_p0)
}
  0x7f   : > { %s3867_s9 = scalar_lea.vmem %s4308_s0, 2048  ;;  %s4041_s27 = smov [#allocation10]  }
  0x80   : > { %p3868_p5 = scmp.ne.s32.totalorder %s4308_s0, %s3867_s9  ;;  %s3872_s10 = sshll.u32 %s4041_s27, 4  ;;  %s3873_s10 = int_to_ptr.vmem [resolvable:$false] %s3872_s10 }
  0x81   : > { %s3874_s29 = scalar_lea.vmem %s3873_s10, 4096  ;;  %p3875_p11 = scmp.lt.s32.totalorder %s4308_s0, %s3873_s10 }
  0x82   : > { %p3870_p13 = pnand %p3868_p5, %p4192_p12  ;;  %p3876_p2 = scmp.lt.s32.totalorder %s3874_s29, %s3867_s9 }
  0x84   : > { %p3871_p1 = pneg %p3870_p13  ;;  %p3877_p10 = por %p3876_p2, %p3875_p11 }
  0x86   : > { %p3878_p3 = pnand %p3877_p10, %p3871_p1 }
  0x88   : > { %3881 = shalt.err (!%p3878_p3)
}
  0x89   : > { %3639 = dma.hbm_to_vmem [thread:$0]  (!%p4169_p9), %s4277_s18, 2048, %s4308_s0, %s4186_s22, %s4913_s15, %s4913_s15, %s4912_s1  }
  0x8a   : > { %s3057_s8 = sshll.u32 %s4030_s17, 12  ;;  %s453_s16 = scalar_lea.vmem [#allocation13], %s3004_s3 }
  0x8b   : > { %s460_s30 = sshll.u32 %s453_s16, 4  ;;  %s4343_s5 = scalar_lea.hbm %s4875_s6, %s3057_s8  ;;  %s4345_s30 = int_to_ptr.vmem [resolvable:$true] %s460_s30 }
  0x8c   : > { %s3882_s26 = scalar_lea.hbm %s4343_s5, 4096  ;;  %s3887_s0 = scalar_lea.hbm %s4875_s6, 8192 }
  0x8d   : > { %p3883_p7 = scmp.ne.s32.totalorder %s4343_s5, %s3882_s26  ;;  %p3888_p8 = scmp.lt.u32.totalorder %s4343_s5, %s4875_s6 }
  0x8e   : > { %p3889_p0 = scmp.lt.u32.totalorder %s3887_s0, %s3882_s26  ;;  %p3891_p13 = scmp.lt.u32.totalorder %s3882_s26, %s4343_s5 }
  0x8f   : > { %p3885_p4 = pnand %p3883_p7, %p4192_p12 }
  0x90   : > { %p3890_p5 = por %p3889_p0, %p3888_p8 }
  0x91   : > { %p3886_p6 = pneg %p3885_p4 }
  0x92   : > { %p3892_p1 = por %p3891_p13, %p3890_p5 }
  0x94   : > { %p3893_p11 = pnand %p3892_p1, %p3886_p6 }
  0x96   : > { %3896 = shalt.err (!%p3893_p11)
}
  0x97   : > { %s3897_s27 = scalar_lea.vmem %s4345_s30, 4096  ;;  %s4042_s10 = smov [#allocation13]  }
  0x98   : > { %p3898_p2 = scmp.ne.s32.totalorder %s4345_s30, %s3897_s27  ;;  %s3902_s29 = sshll.u32 %s4042_s10, 4  ;;  %s3903_s29 = int_to_ptr.vmem [resolvable:$false] %s3902_s29 }
  0x99   : > { %s3904_s16 = scalar_lea.vmem %s3903_s29, 8192  ;;  %p3905_p7 = scmp.lt.s32.totalorder %s4345_s30, %s3903_s29 }
  0x9a   : > { %p3900_p10 = pnand %p3898_p2, %p4192_p12  ;;  %p3906_p4 = scmp.lt.s32.totalorder %s3904_s16, %s3897_s27 }
  0x9c   : > { %p3901_p3 = pneg %p3900_p10  ;;  %p3907_p8 = por %p3906_p4, %p3905_p7 }
  0x9e   : > { %p3908_p0 = pnand %p3907_p8, %p3901_p3 }
  0xa0   : > { %3911 = shalt.err (!%p3908_p0)
}
  0xa1   : > { %s4043_s20 = smov 256   ;;  %s4044_s13 = smov 16  }
  0xa2   : > { %3645 = dma.hbm_to_vmem [thread:$0]  (!%p4169_p9), %s4343_s5, 4096, %s4345_s30, %s4237_s21, %s4043_s20, %s4043_s20, %s4044_s13  }
  0xa3   : > { %s4374_s22 = scalar_lea.hbm %s4876_s7, %s3057_s8  ;;  %s474_s0 = scalar_lea.vmem [#allocation14], %s3004_s3 }
  0xa4   : > { %s481_s12 = sshll.u32 %s474_s0, 4  ;;  %s471_s9 = scalar_lea.sflag [#allocation15], %s4161_s25  ;;  %s4378_s12 = int_to_ptr.vmem [resolvable:$true] %s481_s12 }
  0xa5   : > { %s3912_s27 = scalar_lea.hbm %s4374_s22, 4096  ;;  %s3917_s8 = scalar_lea.hbm %s4876_s7, 8192 }
  0xa6   : > { %p3913_p6 = scmp.ne.s32.totalorder %s4374_s22, %s3912_s27  ;;  %p3918_p1 = scmp.lt.u32.totalorder %s4374_s22, %s4876_s7 }
  0xa7   : > { %p3919_p11 = scmp.lt.u32.totalorder %s3917_s8, %s3912_s27  ;;  %p3921_p10 = scmp.lt.u32.totalorder %s3912_s27, %s4374_s22 }
  0xa8   : > { %p3915_p5 = pnand %p3913_p6, %p4192_p12 }
  0xa9   : > { %p3920_p2 = por %p3919_p11, %p3918_p1 }
  0xaa   : > { %p3916_p13 = pneg %p3915_p5 }
  0xab   : > { %p3922_p3 = por %p3921_p10, %p3920_p2 }
  0xad   : > { %p3923_p7 = pnand %p3922_p3, %p3916_p13 }
  0xaf   : > { %3926 = shalt.err (!%p3923_p7)
}
  0xb0   : > { %s3927_s3 = scalar_lea.vmem %s4378_s12, 4096  ;;  %s4045_s29 = smov [#allocation14]  }
  0xb1   : > { %p3928_p4 = scmp.ne.s32.totalorder %s4378_s12, %s3927_s3  ;;  %s3932_s16 = sshll.u32 %s4045_s29, 4  ;;  %s3933_s16 = int_to_ptr.vmem [resolvable:$false] %s3932_s16 }
  0xb2   : > { %s3934_s20 = scalar_lea.vmem %s3933_s16, 8192  ;;  %p3935_p6 = scmp.lt.s32.totalorder %s4378_s12, %s3933_s16 }
  0xb3   : > { %p3930_p8 = pnand %p3928_p4, %p4192_p12  ;;  %p3936_p5 = scmp.lt.s32.totalorder %s3934_s20, %s3927_s3 }
  0xb5   : > { %p3931_p0 = pneg %p3930_p8  ;;  %p3937_p1 = por %p3936_p5, %p3935_p6 }
  0xb7   : > { %p3938_p11 = pnand %p3937_p1, %p3931_p0 }
  0xb9   : > { %3941 = shalt.err (!%p3938_p11)
}
  0xba   : > { %3648 = dma.hbm_to_vmem [thread:$0]  (!%p4169_p9), %s4374_s22, 4096, %s4378_s12, %s471_s9, %s4913_s15, %s4913_s15, %s4912_s1  }
  0xbb   : > { %p4914_p12 = scmp.ne.s32.totalorder %s4910_s11, 0 }
  0xbc   : > { %s510_s24 = sand.u32 (!%p4914_p12), 1, %s4018_s14   ;;  %p4915_p13 = scmp.ne.s32.totalorder (!%p4914_p12), %s4903_s23, 0 }
  0xbd   : > { %508 = sbr.rel (%p4914_p12) target bundleno = 6398 (0x18fe), region = 60  ;;  %s3011_s13 = sshll.u32 (!%p4914_p12), %s510_s24, 7 }
  0xbe   : > { %s511_s26 = scalar_lea.sflag (!%p4914_p12), [#allocation6], %s510_s24  ;;  %s4410_s18 = scalar_lea.vmem (!%p4914_p12), [#allocation5], %s3011_s13 }
  0xc4   : > { %3993 = dma.done.wait (%p4915_p13), %s511_s26, 2048  }
  0xc5   : > { %3995 = vsyncadd (%p4915_p13), %s511_s26, 4294965248  ;;  %s519_s25 = sand.u32 1, %s4139_s19   ;;  %s4417_s1 = scalar_lea.vmem [#allocation8], %s3011_s13 }
  0xc6   : > { %s520_s28 = scalar_lea.sflag [#allocation9], %s519_s25 }
  0xc7   : > { %3997 = dma.done.wait (%p4915_p13), %s520_s28, 4096  }
  0xc8   : > { %3999 = vsyncadd (%p4915_p13), %s520_s28, 4294963200  ;;  %s4423_s11 = scalar_lea.vmem [#allocation10], %s3011_s13  ;;  %s538_s15 = scalar_lea.sflag [#allocation12], %s519_s25 }
  0xc9   : > { %s4425_s22 = scalar_lea.vmem [#allocation11], %s3011_s13 }
  0xca   : > { %4001 = dma.done.wait (%p4915_p13), %s538_s15, 6144  }
  0xcb   : > { %4003 = vsyncadd (%p4915_p13), %s538_s15, 4294961152  ;;  %s3015_s0 = sshll.u32 %s510_s24, 8  ;;  %s556_s9 = scalar_lea.sflag [#allocation15], %s510_s24 }
  0xcc   : > { %s4431_s12 = scalar_lea.vmem [#allocation13], %s3015_s0  ;;  %s4433_s27 = scalar_lea.vmem [#allocation14], %s3015_s0 }
  0xcd   : > { %4005 = dma.done.wait (%p4915_p13), %s556_s9, 4096  }
  0xce   : > { %4007 = vsyncadd (%p4915_p13), %s556_s9, 4294963200  ;;  %s4916_s21 = sld [smem:[#allocation23_spill]]  ;;  %s4917_s29 = sld [smem:[#allocation31_spill]] }
  0xcf   : > { %s4918_s13 = sld [smem:[#allocation32_spill]] }
  0xd4   : > { %p644_p9 = scmp.lt.s32.totalorder %s4916_s21, 1  ;;  %p3020_p2 = scmp.ne.s32.totalorder %s4916_s21, 0 }
  0xd5   : > { %s4919_s28 = sld [smem:[#allocation27_spill]] (!%p3020_p2)  ;;  %vm665_vm0 = vcmask (!%p3020_p2), 58368   ;;  %v4046_v3 = vmov (!%p3020_p2), 0.0  }
  0xd6   : > { %s645_s30 = scalar_select %p644_p9, %s4916_s21, 1 }
  0xd7   : > { %657 = sbr.rel (%p3020_p2) target bundleno = 228 (0xe4), region = 88 }
  0xd8   : > { %s3059_s8 = sshll.u32 %s645_s30, 4  ;;  %s3019_s5 = sshll.u32 %s645_s30, 1 }
  0xd9   : > { %s4444_s16 = scalar_lea.vmem %s4917_s29, %s3059_s8  ;;  %s4449_s26 = scalar_lea.vmem %s4918_s13, %s3019_s5 }
  0xda   : > { %s4920_s8 = sld [smem:[#allocation28_spill]] (!%p3020_p2) }
  0xdb   : > { %v658_v0 = vld [vmem:[%s4919_s28] sm:$0xff] (!%p3020_p2)  ;;  %v659_v1 = vld [vmem:[%s4919_s28 + $0x8] sm:$0xff] (!%p3020_p2) }
  0xdc   : > { %660 = vst [vmem:[#allocation2] sm:$0xff] (!%p3020_p2), %v658_v0  ;;  %661 = vst [vmem:[#allocation2 + $0x8] sm:$0xff] (!%p3020_p2), %v659_v1 }
  0xe0   : > { %v662_v2 = vld [vmem:[%s4920_s8] sm:$0x3] }
  0xe1   : > { %vm663_vm1 = vcmp.gt.f32.partialorder %v662_v2, 0.5 }
  0xe2   : > { %v664_v4 = vsel %vm663_vm1, -inf, %v4046_v3 }
  0xe3   : > { %666 = vst.msk [vmem:[#allocation4] sm:$0x3] %vm665_vm0, %v664_v4 }
  0xe4 PF: > { %v769_v5 = vld [vmem:[%s4417_s1] sm:$0xff]  ;;  %v770_v6 = vld [vmem:[%s4417_s1 + $0x8] sm:$0xff]  ;;  %v771_v10 = vld [vmem:[%s4417_s1 + $0x10] sm:$0xff]  ;;  %v4047_v55 = vmov 0.0   ;;  %vm4048_vm2 = vmmov 0   ;;  %v688_v56 = vlaneseq  ;;  %vm964_vm3 = vcmask 261120  }
  0xe5   : > { %v672_v7 = vld [vmem:[%s4410_s18] sm:$0xff]  ;;  %v3454_v8 = vpack.c.bf16 %v770_v6, %v769_v5  ;;  %v673_v9 = vld [vmem:[%s4410_s18 + $0x8] sm:$0xff]  ;;  %v772_v11 = vld [vmem:[%s4417_s1 + $0x18] sm:$0xff]  ;;  %vm1041_vm4 = vcmask 64512   ;;  %vm1297_vm5 = vcmask 523520   ;;  %vm1468_vm6 = vcmask 785920  }
  0xe6   : > { %v3422_v12 = vpack.c.bf16 %v673_v9, %v672_v7  ;;  %v3458_v13 = vpack.c.bf16 %v772_v11, %v771_v10  ;;  %v674_v14 = vld [vmem:[%s4410_s18 + $0x10] sm:$0xff]  ;;  %v675_v15 = vld [vmem:[%s4410_s18 + $0x18] sm:$0xff]  ;;  %v773_v16 = vld [vmem:[%s4417_s1 + $0x20] sm:$0xff]  ;;  %v4505_v57 = vshrl.u32 %v688_v56, 7  ;;  %vm1639_vm7 = vcmask 1048320  }
  0xe7   : > { %3455 = vmatprep.subr.bf16.mxu1 %v3454_v8  ;;  %v3426_v17 = vpack.c.bf16 %v675_v15, %v674_v14  ;;  %v774_v18 = vld [vmem:[%s4417_s1 + $0x28] sm:$0xff]  ;;  %v676_v19 = vld [vmem:[%s4410_s18 + $0x20] sm:$0xff]  ;;  %v775_v23 = vld [vmem:[%s4417_s1 + $0x30] sm:$0xff] }
  0xe8   : > { %v677_v20 = vld [vmem:[%s4410_s18 + $0x28] sm:$0xff]  ;;  %3423 = vmatprep.subr.bf16.mxu0 %v3422_v12  ;;  %3457 = vmatpush3.bf16.msra.mxu1 %v3454_v8  ;;  %v3462_v21 = vpack.c.bf16 %v774_v18, %v773_v16  ;;  %v776_v24 = vld [vmem:[%s4417_s1 + $0x38] sm:$0xff]  ;;  %v678_v25 = vld [vmem:[%s4410_s18 + $0x30] sm:$0xff]  ;;  %v787_v58 = vsub.s32 1, %v4505_v57  ;;  %v690_v60 = vsub.s32 0, %v4505_v57 }
  0xe9   : > { %3425 = vmatpush3.bf16.msra.mxu0 %v3422_v12  ;;  %3459 = vmatprep.subr.bf16.mxu1 %v3458_v13  ;;  %v3430_v22 = vpack.c.bf16 %v677_v20, %v676_v19  ;;  %v679_v26 = vld [vmem:[%s4410_s18 + $0x38] sm:$0xff]  ;;  %v3466_v27 = vpack.c.bf16 %v776_v24, %v775_v23  ;;  %v777_v29 = vld [vmem:[%s4417_s1 + $0x40] sm:$0xff]  ;;  %v778_v30 = vld [vmem:[%s4417_s1 + $0x48] sm:$0xff] }
  0xea   : > { %3427 = vmatprep.subr.bf16.mxu0 %v3426_v17  ;;  %v3434_v28 = vpack.c.bf16 %v679_v26, %v678_v25  ;;  %v4479_v31 = vld [vmem:[#allocation2] sm:$0xff]  ;;  %v681_v33 = vld [vmem:[%s4410_s18 + $0x48] sm:$0xff]  ;;  %v3470_v34 = vpack.c.bf16 %v778_v30, %v777_v29  ;;  %v779_v36 = vld [vmem:[%s4417_s1 + $0x50] sm:$0xff] }
  0xeb   : > { %v680_v32 = vld [vmem:[%s4410_s18 + $0x40] sm:$0xff]  ;;  %3269 = vmatprep.mubr.f32.mxu1 %v4479_v31  ;;  %3234 = vmatprep.mubr.f32.mxu0 %v4479_v31  ;;  %v780_v37 = vld [vmem:[%s4417_s1 + $0x58] sm:$0xff]  ;;  %v682_v38 = vld [vmem:[%s4410_s18 + $0x50] sm:$0xff] }
  0xec   : > { %3461 = vmatpush3.bf16.msra.mxu1 %v3458_v13  ;;  %v3438_v35 = vpack.c.bf16 %v681_v33, %v680_v32  ;;  %v683_v39 = vld [vmem:[%s4410_s18 + $0x58] sm:$0xff]  ;;  %v3474_v40 = vpack.c.bf16 %v780_v37, %v779_v36  ;;  %v781_v42 = vld [vmem:[%s4417_s1 + $0x60] sm:$0xff]  ;;  %v782_v43 = vld [vmem:[%s4417_s1 + $0x68] sm:$0xff] }
  0xed   : > { %3429 = vmatpush3.bf16.msra.mxu0 %v3426_v17  ;;  %3463 = vmatprep.subr.bf16.mxu1 %v3462_v21  ;;  %v3442_v41 = vpack.c.bf16 %v683_v39, %v682_v38  ;;  %v684_v44 = vld [vmem:[%s4410_s18 + $0x60] sm:$0xff]  ;;  %v685_v45 = vld [vmem:[%s4410_s18 + $0x68] sm:$0xff]  ;;  %v3478_v46 = vpack.c.bf16 %v782_v43, %v781_v42  ;;  %v783_v48 = vld [vmem:[%s4417_s1 + $0x70] sm:$0xff]  ;;  %v882_v43 = vsub.s32 2, %v4505_v57 }
  0xee   : > { %3431 = vmatprep.subr.bf16.mxu0 %v3430_v22  ;;  %v3446_v47 = vpack.c.bf16 %v685_v45, %v684_v44  ;;  %v784_v49 = vld [vmem:[%s4417_s1 + $0x78] sm:$0xff]  ;;  %v686_v50 = vld [vmem:[%s4410_s18 + $0x70] sm:$0xff]  ;;  %v4497_v54 = vld [vmem:[#allocation2 + $0x8] sm:$0xff]  ;;  %s4050_s1 = smov 64  }
  0xef   : > { %v687_v51 = vld [vmem:[%s4410_s18 + $0x78] sm:$0xff]  ;;  %v3482_v52 = vpack.c.bf16 %v784_v49, %v783_v48  ;;  %s4049_s18 = smov 96   ;;  %v864_v8 = vld [vmem:[%s4423_s11] sm:$0xff]  ;;  %v865_v9 = vld [vmem:[%s4423_s11 + $0x8] sm:$0xff] }
  0xf0   : > { %3465 = vmatpush3.bf16.msra.mxu1 %v3462_v21  ;;  %v3450_v53 = vpack.c.bf16 %v687_v51, %v686_v50  ;;  %v4509_v59 = vld [vmem:[%s4444_s16] sm:$0xff]  ;;  %v866_v10 = vld [vmem:[%s4423_s11 + $0x10] sm:$0xff]  ;;  %v3486_v11 = vpack.c.bf16 %v865_v9, %v864_v8  ;;  %v869_v15 = vld [vmem:[%s4423_s11 + $0x28] sm:$0xff] }
  0xf1   : > { %3433 = vmatpush3.bf16.msra.mxu0 %v3430_v22  ;;  %3467 = vmatprep.subr.bf16.mxu1 %v3466_v27  ;;  %v788_v61 = vrot.slane %v4509_v59, %v787_v58  ;;  %v691_v62 = vrot.slane %v4509_v59, %v690_v60  ;;  %v867_v12 = vld [vmem:[%s4423_s11 + $0x18] sm:$0xff]  ;;  %v868_v14 = vld [vmem:[%s4423_s11 + $0x20] sm:$0xff]  ;;  %v870_v17 = vld [vmem:[%s4423_s11 + $0x30] sm:$0xff]  ;;  %v883_v44 = vrot.slane %v4509_v59, %v882_v43 }
  0xf2   : > { %3435 = vmatprep.subr.bf16.mxu0 %v3434_v28  ;;  %v3490_v13 = vpack.c.bf16 %v867_v12, %v866_v10  ;;  %v3494_v16 = vpack.c.bf16 %v869_v15, %v868_v14  ;;  %v871_v18 = vld [vmem:[%s4423_s11 + $0x38] sm:$0xff]  ;;  %v872_v20 = vld [vmem:[%s4423_s11 + $0x40] sm:$0xff]  ;;  %v873_v21 = vld [vmem:[%s4423_s11 + $0x48] sm:$0xff] }
  0xf3   : > { %v3498_v19 = vpack.c.bf16 %v871_v18, %v870_v17  ;;  %v3502_v22 = vpack.c.bf16 %v873_v21, %v872_v20  ;;  %v874_v23 = vld [vmem:[%s4423_s11 + $0x50] sm:$0xff]  ;;  %v875_v24 = vld [vmem:[%s4423_s11 + $0x58] sm:$0xff]  ;;  %v876_v26 = vld [vmem:[%s4423_s11 + $0x60] sm:$0xff] }
  0xf4   : > { %3469 = vmatpush3.bf16.msra.mxu1 %v3466_v27  ;;  %v3506_v25 = vpack.c.bf16 %v875_v24, %v874_v23  ;;  %v877_v27 = vld [vmem:[%s4423_s11 + $0x68] sm:$0xff]  ;;  %v878_v29 = vld [vmem:[%s4423_s11 + $0x70] sm:$0xff]  ;;  %v879_v30 = vld [vmem:[%s4423_s11 + $0x78] sm:$0xff]  ;;  %s4051_s11 = smov 32  }
  0xf5   : > { %3437 = vmatpush3.bf16.msra.mxu0 %v3434_v28  ;;  %3471 = vmatprep.subr.bf16.mxu1 %v3470_v34  ;;  %v3510_v28 = vpack.c.bf16 %v877_v27, %v876_v26  ;;  %v3514_v32 = vpack.c.bf16 %v879_v30, %v878_v29  ;;  %v4554_v33 = vld [vmem:[#allocation4] ss:$0 sm:$0xff] }
  0xf6   : > { %3439 = vmatprep.subr.bf16.mxu0 %v3438_v35 }
  0xf8   : > { %3473 = vmatpush3.bf16.msra.mxu1 %v3470_v34 }
  0xf9   : > { %3441 = vmatpush3.bf16.msra.mxu0 %v3438_v35  ;;  %3475 = vmatprep.subr.bf16.mxu1 %v3474_v40 }
  0xfa   : > { %3443 = vmatprep.subr.bf16.mxu0 %v3442_v41 }
  0xfc   : > { %3477 = vmatpush3.bf16.msra.mxu1 %v3474_v40 }
  0xfd   : > { %3445 = vmatpush3.bf16.msra.mxu0 %v3442_v41  ;;  %3479 = vmatprep.subr.bf16.mxu1 %v3478_v46 }
  0xfe   : > { %3447 = vmatprep.subr.bf16.mxu0 %v3446_v47 }
 0x100   : > { %3481 = vmatpush3.bf16.msra.mxu1 %v3478_v46 }
 0x101   : > { %3449 = vmatpush3.bf16.msra.mxu0 %v3446_v47  ;;  %3483 = vmatprep.subr.bf16.mxu1 %v3482_v52 }
 0x102   : > { %3451 = vmatprep.subr.bf16.mxu0 %v3450_v53 }
 0x104   : > { %3485 = vmatpush3.bf16.msra.mxu1 %v3482_v52 }
 0x105   : > { %3453 = vmatpush3.bf16.msra.mxu0 %v3450_v53  ;;  %3307 = vmatprep.subr.mxu1 %v4047_v55 }
 0x106   : > { %3487 = vmatprep.subr.bf16.mxu0 %v3486_v11 }
 0x107   : > { %3270 = vmatmul.mubr.f32.vlgmr.msra.gmra.mrb[0].mxu1 %v4497_v54 }
 0x108   : > { %3235 = vmatmul.mubr.f32.vlgmr.msra.gmra.mrb[0].mxu0 %v4497_v54  ;;  %3309 = vmatprep.mubr.msk.f32.mxu1 %vm4048_vm2, %v4047_v55 }
 0x109   : > { %3304 = vmatprep.mubr.f32.mxu0 %v4479_v31  ;;  %3489 = vmatpush3.bf16.msra.mxu0 %v3486_v11 }
 0x10a   : > { %3491 = vmatprep.subr.bf16.mxu0 %v3490_v13 }
 0x10d   : > { %3493 = vmatpush3.bf16.msra.mxu0 %v3490_v13 }
 0x10e   : > { %3495 = vmatprep.subr.bf16.mxu0 %v3494_v16 }
 0x111   : > { %3497 = vmatpush3.bf16.msra.mxu0 %v3494_v16 }
 0x112   : > { %3499 = vmatprep.subr.bf16.mxu0 %v3498_v19 }
 0x115   : > { %3501 = vmatpush3.bf16.msra.mxu0 %v3498_v19 }
 0x116   : > { %3503 = vmatprep.subr.bf16.mxu0 %v3502_v22 }
 0x119   : > { %3505 = vmatpush3.bf16.msra.mxu0 %v3502_v22 }
 0x11a   : > { %3507 = vmatprep.subr.bf16.mxu0 %v3506_v25 }
 0x11d   : > { %3509 = vmatpush3.bf16.msra.mxu0 %v3506_v25 }
 0x11e   : > { %3511 = vmatprep.subr.bf16.mxu0 %v3510_v28 }
 0x121   : > { %3513 = vmatpush3.bf16.msra.mxu0 %v3510_v28 }
 0x122   : > { %3515 = vmatprep.subr.bf16.mxu0 %v3514_v32 }
 0x125   : > { %3517 = vmatpush3.bf16.msra.mxu0 %v3514_v32 }
 0x128   : > { %3305 = vmatmul.mubr.f32.vlgmr.msra.gmra.mrb[2].mxu0 %v4497_v54 }
 0x1da   : > { %v3271_v63 = vpop.f32.mrb[0].mxu1 }
 0x1db   : > { %v4518_v0 = vadd.f32 %v3271_v63, %v788_v61  ;;  %v3236_v1 = vpop.f32.mrb[0].mxu0  ;;  %v855_v2 = vpop.f32.mrb[1].mxu1 }
 0x1dc   : > { %v4520_v3 = vadd.f32 %v3236_v1, %v691_v62  ;;  %v4522_v4 = vadd.f32 %v855_v2, %v788_v61  ;;  %v758_v5 = vpop.f32.mrb[1].mxu0 }
 0x1dd   : > { %v759_v6 = vadd.f32 %v758_v5, %v691_v62 }
 0x1de   : > { %1129 = vrot.lane.b32.xlu1 %v4522_v4, %s4049_s18  ;;  %3308 = vmatpush3.xpose.msk.msra.mxu1 %vm964_vm3, %v4522_v4 }
 0x1df   : > { %v4528_v7 = vmul.f32 0.17677669, %v759_v6  ;;  %3312 = vmatprep.subr.mxu1 %v4047_v55 }
 0x1e1   : > { %3310 = vmatmul.mubr.msk.f32.vlgmr.msra.gmra.mrb[2].mxu1 %vm964_vm3, %v4528_v7 }
 0x1e2   : > { %1127 = vrot.lane.b32.xlu1 %v4528_v7, %s4049_s18  ;;  %3314 = vmatprep.mubr.msk.f32.mxu1 %vm4048_vm2, %v4047_v55 }
 0x1fb   : > { %v3306_v45 = vpop.f32.mrb[2].mxu0 }
 0x1fc   : > { %v950_v46 = vpop.f32.mrb[3].mxu0  ;;  %v4561_v47 = vadd.f32 %v3306_v45, %v883_v44 }
 0x1fd   : > { %v4563_v48 = vadd.f32 %v950_v46, %v883_v44 }
 0x1ff   : > { %3313 = vmatpush3.msra.mxu1 %v4563_v48 }
 0x200   : > { %3317 = vmatprep.subr.mxu1 %v4047_v55 }
 0x250   : > { %v1130_v51 = vpop.permute.xlu1 %1129 }
 0x254   : > { %v1128_v53 = vpop.permute.xlu1 %1127 }
 0x2b4   : > { %v1037_v34 = vpop.f32.mrb[2].mxu1 }
 0x2b5   : > { %v1038_v35 = vadd.f32 %v4554_v33, %v1037_v34  ;;  %v3311_v36 = vpop.f32.mrb[3].mxu1 }
 0x2b7   : > { %v1042_v37 = vsel %vm1041_vm4, %v1038_v35, -inf }
 0x2b8   : > { %1043 = vmax.xlane.f32.xlu0 %v1042_v37 }
 0x345   : > { %v1044_v38 = vpop.xlane.xlu0 %1043 }
 0x346   : > { %v1045_v39 = vsub.f32 %v1038_v35, %v1044_v38 }
 0x348   : > { %v1046_v40 = vmul.f32 1.442695, %v1045_v39 }
 0x34a   : > { %3713 = vpow2.f32 %v1046_v40 }
 0x354   : > { %v3714_v41 = vpop.eup %3713 }
 0x355   : > { %v1048_v42 = vsel %vm1041_vm4, %v3714_v41, 0.0 }
 0x356   : > { %1049 = vadd.xlane.f32.xlu0 %v1048_v42 }
 0x3e3   : > { %v1050_v49 = vpop.xlane.xlu0 %1049 }
 0x3e4   : > { %3715 = vrcp.f32 %v1050_v49 }
 0x3ee   : > { %v3716_v50 = vpop.eup %3715 }
 0x3ef   : > { %v1052_v52 = vmul.f32 %v3716_v50, %v3714_v41 }
 0x3f1   : > { %3315 = vmatmul.mubr.msk.f32.vlgmr.msra.gmra.mrb[4].mxu1 %vm1041_vm4, %v1052_v52  ;;  %v4639_v52 = vld [vmem:[#allocation4 + $0x1] ss:$0 sm:$0xff] }
 0x3f2   : > { %3318 = vmatpush3.xpose.msk.msra.mxu1 %vm964_vm3, %v1130_v51  ;;  %3319 = vmatprep.mubr.msk.f32.mxu1 %vm4048_vm2, %v4047_v55 }
 0x3f3   : > { %3322 = vmatprep.subr.mxu1 %v4047_v55 }
 0x3f5   : > { %3320 = vmatmul.mubr.msk.f32.vlgmr.msra.gmra.mrb[6].mxu1 %vm964_vm3, %v1128_v53 }
 0x3f6   : > { %3324 = vmatprep.mubr.msk.f32.mxu1 %vm4048_vm2, %v4047_v55 }
 0x4c4   : > { %v1122_v56 = vpop.f32.mrb[4].mxu1 }
 0x4c5   : > { %1126 = vst.msk [vmem:[#allocation3] sm:$0xff] %vm964_vm3, %v1122_v56  ;;  %v3316_v61 = vpop.f32.mrb[5].mxu1 }
 0x4c8   : > { %v1201_v62 = vpop.f32.mrb[6].mxu1 }
 0x4c9   : > { %v1202_v63 = vadd.f32 %v4554_v33, %v1201_v62  ;;  %v3321_v1 = vpop.f32.mrb[7].mxu1 }
 0x4cb   : > { %v1205_v2 = vsel %vm1041_vm4, %v1202_v63, -inf }
 0x4cc   : > { %1206 = vmax.xlane.f32.xlu0 %v1205_v2 }
 0x4e2   : > { %1217 = vrot.lane.b32.xlu0 %v4563_v48, %s4049_s18 }
 0x4e6   : > { %1301 = vrot.lane.b32.xlu0 %v4522_v4, %s4050_s1 }
 0x4ea   : > { %1299 = vrot.lane.b32.xlu0 %v4528_v7, %s4050_s1 }
 0x559   : > { %v1207_v5 = vpop.xlane.xlu0 %1206 }
 0x55a   : > { %v1208_v6 = vsub.f32 %v1202_v63, %v1207_v5 }
 0x55c   : > { %v1209_v8 = vmul.f32 1.442695, %v1208_v6 }
 0x55d   : > { %v1218_v9 = vpop.permute.xlu0 %1217 }
 0x55e   : > { %3717 = vpow2.f32 %v1209_v8  ;;  %3323 = vmatpush3.msra.mxu1 %v1218_v9 }
 0x55f   : > { %3327 = vmatprep.subr.mxu1 %v4047_v55 }
 0x561   : > { %v1302_v14 = vpop.permute.xlu0 %1301 }
 0x565   : > { %v1300_v16 = vpop.permute.xlu0 %1299 }
 0x568   : > { %v3718_v10 = vpop.eup %3717 }
 0x569   : > { %v1211_v11 = vsel %vm1041_vm4, %v3718_v10, 0.0 }
 0x56a   : > { %1212 = vadd.xlane.f32.xlu1 %v1211_v11 }
 0x57b   : > { %1388 = vrot.lane.b32.xlu1 %v4563_v48, %s4050_s1 }
 0x57f   : > { %1472 = vrot.lane.b32.xlu1 %v4522_v4, %s4051_s11 }
 0x5f7   : > { %v1213_v12 = vpop.xlane.xlu1 %1212 }
 0x5f8   : > { %3719 = vrcp.f32 %v1213_v12 }
 0x5fb   : > { %v1389_v17 = vpop.permute.xlu1 %1388 }
 0x5ff   : > { %v1473_v28 = vpop.permute.xlu1 %1472 }
 0x602   : > { %v3720_v13 = vpop.eup %3719 }
 0x603   : > { %v1215_v15 = vmul.f32 %v3720_v13, %v3718_v10 }
 0x605   : > { %3325 = vmatmul.mubr.msk.f32.vlgmr.msra.gmra.mrb[8].mxu1 %vm1041_vm4, %v1215_v15 }
 0x606   : > { %3328 = vmatpush3.xpose.msk.msra.mxu1 %vm964_vm3, %v1302_v14  ;;  %3329 = vmatprep.mubr.msk.f32.mxu1 %vm4048_vm2, %v4047_v55 }
 0x607   : > { %3332 = vmatprep.subr.mxu1 %v4047_v55 }
 0x609   : > { %3330 = vmatmul.mubr.msk.f32.vlgmr.msra.gmra.mrb[10].mxu1 %vm964_vm3, %v1300_v16 }
 0x60a   : > { %3333 = vmatpush3.msra.mxu1 %v1389_v17  ;;  %3334 = vmatprep.mubr.msk.f32.mxu1 %vm4048_vm2, %v4047_v55 }
 0x60b   : > { %3337 = vmatprep.subr.mxu1 %v4047_v55 }
 0x6d8   : > { %v4599_v4 = vpop.f32.mrb[8].mxu1 }
 0x6d9   : > { %v3326_v18 = vpop.f32.mrb[9].mxu1 }
 0x6dc   : > { %v1373_v19 = vpop.f32.mrb[10].mxu1 }
 0x6dd   : > { %v1374_v20 = vadd.f32 %v4554_v33, %v1373_v19  ;;  %v3331_v21 = vpop.f32.mrb[11].mxu1 }
 0x6df   : > { %v1377_v22 = vsel %vm1041_vm4, %v1374_v20, -inf }
 0x6e0   : > { %1378 = vmax.xlane.f32.xlu0 %v1377_v22 }
 0x76d   : > { %v1379_v23 = vpop.xlane.xlu0 %1378 }
 0x76e   : > { %v1380_v24 = vsub.f32 %v1374_v20, %v1379_v23 }
 0x770   : > { %v1381_v25 = vmul.f32 1.442695, %v1380_v24 }
 0x772   : > { %3721 = vpow2.f32 %v1381_v25 }
 0x77c   : > { %v3722_v26 = vpop.eup %3721 }
 0x77d   : > { %v1383_v27 = vsel %vm1041_vm4, %v3722_v26, 0.0 }
 0x77e   : > { %1384 = vadd.xlane.f32.xlu1 %v1383_v27 }
 0x78f   : > { %1470 = vrot.lane.b32.xlu1 %v4528_v7, %s4051_s11 }
 0x80b   : > { %v1385_v29 = vpop.xlane.xlu1 %1384 }
 0x80c   : > { %3723 = vrcp.f32 %v1385_v29 }
 0x80f   : > { %v1471_v34 = vpop.permute.xlu1 %1470 }
 0x816   : > { %v3724_v30 = vpop.eup %3723 }
 0x817   : > { %v1387_v32 = vmul.f32 %v3724_v30, %v3722_v26 }
 0x819   : > { %3335 = vmatmul.mubr.msk.f32.vlgmr.msra.gmra.mrb[12].mxu1 %vm1041_vm4, %v1387_v32 }
 0x81a   : > { %3338 = vmatpush3.xpose.msk.msra.mxu1 %vm964_vm3, %v1473_v28  ;;  %3339 = vmatprep.mubr.msk.f32.mxu1 %vm4048_vm2, %v4047_v55 }
 0x81b   : > { %3342 = vmatprep.subr.mxu1 %v4047_v55 }
 0x81d   : > { %3340 = vmatmul.mubr.msk.f32.vlgmr.msra.gmra.mrb[14].mxu1 %vm964_vm3, %v1471_v34 }
 0x81e   : > { %3344 = vmatprep.mubr.msk.f32.mxu1 %vm4048_vm2, %v4047_v55 }
 0x8ec   : > { %v4614_v7 = vpop.f32.mrb[12].mxu1 }
 0x8ed   : > { %v3336_v35 = vpop.f32.mrb[13].mxu1 }
 0x8f0   : > { %v1544_v36 = vpop.f32.mrb[14].mxu1 }
 0x8f1   : > { %v1545_v37 = vadd.f32 %v4554_v33, %v1544_v36  ;;  %v3341_v38 = vpop.f32.mrb[15].mxu1 }
 0x8f3   : > { %v1548_v39 = vsel %vm1041_vm4, %v1545_v37, -inf }
 0x8f4   : > { %1549 = vmax.xlane.f32.xlu0 %v1548_v39 }
 0x90a   : > { %1559 = vrot.lane.b32.xlu0 %v4563_v48, %s4051_s11  ;;  %v4628_v48 = vmul.f32 0.17677669, %v4520_v3 }
 0x981   : > { %v1550_v40 = vpop.xlane.xlu0 %1549 }
 0x982   : > { %v1551_v41 = vsub.f32 %v1545_v37, %v1550_v40 }
 0x984   : > { %v1552_v42 = vmul.f32 1.442695, %v1551_v41 }
 0x985   : > { %v1560_v43 = vpop.permute.xlu0 %1559 }
 0x986   : > { %3725 = vpow2.f32 %v1552_v42  ;;  %3343 = vmatpush3.msra.mxu1 %v1560_v43 }
 0x987   : > { %3347 = vmatprep.subr.mxu1 %v4047_v55 }
 0x990   : > { %v3726_v44 = vpop.eup %3725 }
 0x991   : > { %v1554_v45 = vsel %vm1041_vm4, %v3726_v44, 0.0 }
 0x992   : > { %1555 = vadd.xlane.f32.xlu1 %v1554_v45 }
 0xa1f   : > { %v1556_v33 = vpop.xlane.xlu1 %1555 }
 0xa20   : > { %3727 = vrcp.f32 %v1556_v33 }
 0xa2a   : > { %v3728_v46 = vpop.eup %3727 }
 0xa2b   : > { %v1558_v49 = vmul.f32 %v3728_v46, %v3726_v44 }
 0xa2d   : > { %3345 = vmatmul.mubr.msk.f32.vlgmr.msra.gmra.mrb[16].mxu1 %vm1041_vm4, %v1558_v49 }
 0xa2e   : > { %3348 = vmatpush3.xpose.msk.msra.mxu1 %vm964_vm3, %v4518_v0  ;;  %3349 = vmatprep.mubr.msk.f32.mxu1 %vm4048_vm2, %v4047_v55 }
 0xa2f   : > { %3352 = vmatprep.subr.mxu1 %v4047_v55 }
 0xa31   : > { %3350 = vmatmul.mubr.msk.f32.vlgmr.msra.gmra.mrb[18].mxu1 %vm964_vm3, %v4628_v48 }
 0xa32   : > { %3353 = vmatpush3.msra.mxu1 %v4561_v47  ;;  %3354 = vmatprep.mubr.msk.f32.mxu1 %vm4048_vm2, %v4047_v55 }
 0xa33   : > { %3357 = vmatprep.subr.mxu1 %v4047_v55 }
 0xb00   : > { %v4637_v50 = vpop.f32.mrb[16].mxu1 }
 0xb01   : > { %v3346_v51 = vpop.f32.mrb[17].mxu1 }
 0xb04   : > { %v1718_v53 = vpop.f32.mrb[18].mxu1 }
 0xb05   : > { %v1719_v3 = vadd.f32 %v4639_v52, %v1718_v53  ;;  %v3351_v56 = vpop.f32.mrb[19].mxu1 }
 0xb07   : > { %v1722_v61 = vsel %vm1041_vm4, %v1719_v3, -inf }
 0xb08   : > { %1723 = vmax.xlane.f32.xlu0 %v1722_v61 }
 0xb1e   : > { %1807 = vrot.lane.b32.xlu0 %v4628_v48, %s4049_s18 }
 0xb95   : > { %v1724_v62 = vpop.xlane.xlu0 %1723 }
 0xb96   : > { %v1725_v63 = vsub.f32 %v1719_v3, %v1724_v62 }
 0xb98   : > { %v1726_v1 = vmul.f32 1.442695, %v1725_v63 }
 0xb99   : > { %v1808_v11 = vpop.permute.xlu0 %1807 }
 0xb9a   : > { %3729 = vpow2.f32 %v1726_v1 }
 0xba4   : > { %v3730_v2 = vpop.eup %3729 }
 0xba5   : > { %v1728_v5 = vsel %vm1041_vm4, %v3730_v2, 0.0 }
 0xba6   : > { %1729 = vadd.xlane.f32.xlu1 %v1728_v5 }
 0xbb7   : > { %1809 = vrot.lane.b32.xlu1 %v4518_v0, %s4049_s18 }
 0xc33   : > { %v1730_v6 = vpop.xlane.xlu1 %1729 }
 0xc34   : > { %3731 = vrcp.f32 %v1730_v6 }
 0xc37   : > { %v1810_v10 = vpop.permute.xlu1 %1809 }
 0xc3e   : > { %v3732_v8 = vpop.eup %3731 }
 0xc3f   : > { %v1732_v9 = vmul.f32 %v3732_v8, %v3730_v2 }
 0xc41   : > { %3355 = vmatmul.mubr.msk.f32.vlgmr.msra.gmra.mrb[20].mxu1 %vm1041_vm4, %v1732_v9 }
 0xc42   : > { %3358 = vmatpush3.xpose.msk.msra.mxu1 %vm964_vm3, %v1810_v10  ;;  %3359 = vmatprep.mubr.msk.f32.mxu1 %vm4048_vm2, %v4047_v55 }
 0xc43   : > { %3362 = vmatprep.subr.mxu1 %v4047_v55 }
 0xc45   : > { %3360 = vmatmul.mubr.msk.f32.vlgmr.msra.gmra.mrb[22].mxu1 %vm964_vm3, %v1808_v11  ;;  %v2321_v11 = vld [vmem:[%s4425_s22 + $0x8] sm:$0xff] }
 0xc46   : > { %3364 = vmatprep.mubr.msk.f32.mxu1 %vm4048_vm2, %v4047_v55 }
 0xd14   : > { %v1802_v12 = vpop.f32.mrb[20].mxu1 }
 0xd15   : > { %1806 = vst.msk [vmem:[#allocation3 + $0x8] sm:$0xff] %vm964_vm3, %v1802_v12  ;;  %v3356_v13 = vpop.f32.mrb[21].mxu1  ;;  %v2322_v12 = vld [vmem:[%s4425_s22 + $0x10] sm:$0xff] }
 0xd18   : > { %v1881_v14 = vpop.f32.mrb[22].mxu1 }
 0xd19   : > { %v1882_v15 = vadd.f32 %v4639_v52, %v1881_v14  ;;  %v3361_v16 = vpop.f32.mrb[23].mxu1  ;;  %v2323_v14 = vld [vmem:[%s4425_s22 + $0x18] sm:$0xff] }
 0xd1a   : > { %v2324_v16 = vld [vmem:[%s4425_s22 + $0x20] sm:$0xff] }
 0xd1b   : > { %v1885_v17 = vsel %vm1041_vm4, %v1882_v15, -inf }
 0xd1c   : > { %1886 = vmax.xlane.f32.xlu1 %v1885_v17  ;;  %v2325_v17 = vld [vmem:[%s4425_s22 + $0x28] sm:$0xff] }
 0xd2d   : > { %1897 = vrot.lane.b32.xlu1 %v4561_v47, %s4049_s18 }
 0xd31   : > { %1978 = vrot.lane.b32.xlu1 %v4628_v48, %s4050_s1 }
 0xda9   : > { %v1887_v18 = vpop.xlane.xlu1 %1886 }
 0xdaa   : > { %v1888_v19 = vsub.f32 %v1882_v15, %v1887_v18  ;;  %v3522_v15 = vpack.c.bf16 %v2323_v14, %v2322_v12  ;;  %v3526_v18 = vpack.c.bf16 %v2325_v17, %v2324_v16  ;;  %v2471_v16 = vld [vmem:[%s4431_s12 + $0x78] sm:$0xff] }
 0xdac   : > { %v1889_v20 = vmul.f32 1.442695, %v1888_v19  ;;  %v2326_v19 = vld [vmem:[%s4425_s22 + $0x30] sm:$0xff] }
 0xdad   : > { %v1898_v21 = vpop.permute.xlu1 %1897 }
 0xdae   : > { %3733 = vpow2.f32 %v1889_v20  ;;  %3363 = vmatpush3.msra.mxu1 %v1898_v21  ;;  %v2327_v20 = vld [vmem:[%s4425_s22 + $0x38] sm:$0xff] }
 0xdaf   : > { %3367 = vmatprep.subr.mxu1 %v4047_v55  ;;  %v3530_v21 = vpack.c.bf16 %v2327_v20, %v2326_v19  ;;  %v2470_v19 = vld [vmem:[%s4431_s12 + $0x70] sm:$0xff] }
 0xdb1   : > { %v1979_v28 = vpop.permute.xlu1 %1978 }
 0xdb8   : > { %v3734_v22 = vpop.eup %3733 }
 0xdb9   : > { %v1891_v23 = vsel %vm1041_vm4, %v3734_v22, 0.0 }
 0xdba   : > { %1892 = vadd.xlane.f32.xlu0 %v1891_v23  ;;  %v2329_v23 = vld [vmem:[%s4425_s22 + $0x48] sm:$0xff] }
 0xdd0   : > { %1980 = vrot.lane.b32.xlu0 %v4518_v0, %s4050_s1 }
 0xe47   : > { %v1893_v24 = vpop.xlane.xlu0 %1892 }
 0xe48   : > { %3735 = vrcp.f32 %v1893_v24 }
 0xe4b   : > { %v1981_v27 = vpop.permute.xlu0 %1980 }
 0xe52   : > { %v3736_v25 = vpop.eup %3735 }
 0xe53   : > { %v1895_v26 = vmul.f32 %v3736_v25, %v3734_v22  ;;  %v2328_v22 = vld [vmem:[%s4425_s22 + $0x40] sm:$0xff]  ;;  %v2330_v25 = vld [vmem:[%s4425_s22 + $0x50] sm:$0xff] }
 0xe54   : > { %v3534_v24 = vpack.c.bf16 %v2329_v23, %v2328_v22  ;;  %v2475_v22 = vld [vmem:[%s4431_s12 + $0x98] sm:$0xff] }
 0xe55   : > { %3365 = vmatmul.mubr.msk.f32.vlgmr.msra.gmra.mrb[24].mxu1 %vm1041_vm4, %v1895_v26  ;;  %v2331_v26 = vld [vmem:[%s4425_s22 + $0x58] sm:$0xff] }
 0xe56   : > { %3368 = vmatpush3.xpose.msk.msra.mxu1 %vm964_vm3, %v1981_v27  ;;  %3369 = vmatprep.mubr.msk.f32.mxu1 %vm4048_vm2, %v4047_v55  ;;  %v3538_v27 = vpack.c.bf16 %v2331_v26, %v2330_v25  ;;  %v2474_v25 = vld [vmem:[%s4431_s12 + $0x90] sm:$0xff]  ;;  %v2477_v26 = vld [vmem:[%s4431_s12 + $0xa8] sm:$0xff] }
 0xe57   : > { %3372 = vmatprep.subr.mxu1 %v4047_v55 }
 0xe59   : > { %3370 = vmatmul.mubr.msk.f32.vlgmr.msra.gmra.mrb[26].mxu1 %vm964_vm3, %v1979_v28  ;;  %v2332_v28 = vld [vmem:[%s4425_s22 + $0x60] sm:$0xff] }
 0xe5a   : > { %3374 = vmatprep.mubr.msk.f32.mxu1 %vm4048_vm2, %v4047_v55 }
 0xf28   : > { %v1969_v29 = vpop.f32.mrb[24].mxu1 }
 0xf29   : > { %v3366_v30 = vpop.f32.mrb[25].mxu1 }
 0xf2c   : > { %v2052_v32 = vpop.f32.mrb[26].mxu1 }
 0xf2d   : > { %v2053_v34 = vadd.f32 %v4639_v52, %v2052_v32  ;;  %v3371_v35 = vpop.f32.mrb[27].mxu1  ;;  %v2334_v32 = vld [vmem:[%s4425_s22 + $0x70] sm:$0xff] }
 0xf2f   : > { %v2056_v36 = vsel %vm1041_vm4, %v2053_v34, -inf }
 0xf30   : > { %2057 = vmax.xlane.f32.xlu1 %v2056_v36 }
 0xf41   : > { %2067 = vrot.lane.b32.xlu1 %v4561_v47, %s4050_s1 }
 0xf45   : > { %2148 = vrot.lane.b32.xlu1 %v4628_v48, %s4051_s11 }
 0xfbd   : > { %v2058_v37 = vpop.xlane.xlu1 %2057 }
 0xfbe   : > { %v2059_v38 = vsub.f32 %v2053_v34, %v2058_v37  ;;  %v2335_v34 = vld [vmem:[%s4425_s22 + $0x78] sm:$0xff] }
 0xfbf   : > { %v3546_v35 = vpack.c.bf16 %v2335_v34, %v2334_v32  ;;  %v2481_v34 = vld [vmem:[%s4431_s12 + $0xc8] sm:$0xff] }
 0xfc0   : > { %v2060_v39 = vmul.f32 1.442695, %v2059_v38 }
 0xfc1   : > { %v2068_v40 = vpop.permute.xlu1 %2067 }
 0xfc2   : > { %3737 = vpow2.f32 %v2060_v39  ;;  %3373 = vmatpush3.msra.mxu1 %v2068_v40  ;;  %v2338_v40 = vsub.s32 3, %v4505_v57 }
 0xfc3   : > { %3377 = vmatprep.subr.mxu1 %v4047_v55 }
 0xfc5   : > { %v2149_v46 = vpop.permute.xlu1 %2148 }
 0xfcc   : > { %v3738_v41 = vpop.eup %3737 }
 0xfcd   : > { %v2062_v42 = vsel %vm1041_vm4, %v3738_v41, 0.0 }
 0xfce   : > { %2063 = vadd.xlane.f32.xlu0 %v2062_v42 }
 0xfe4   : > { %2150 = vrot.lane.b32.xlu0 %v4518_v0, %s4051_s11 }
0x105b   : > { %v2064_v43 = vpop.xlane.xlu0 %2063 }
0x105c   : > { %3739 = vrcp.f32 %v2064_v43 }
0x105f   : > { %v2151_v33 = vpop.permute.xlu0 %2150 }
0x1066   : > { %v3740_v44 = vpop.eup %3739 }
0x1067   : > { %v2066_v45 = vmul.f32 %v3740_v44, %v3738_v41  ;;  %v2339_v41 = vrot.slane %v4509_v59, %v2338_v40  ;;  %v2485_v40 = vld [vmem:[%s4431_s12 + $0xe8] sm:$0xff] }
0x1069   : > { %3375 = vmatmul.mubr.msk.f32.vlgmr.msra.gmra.mrb[28].mxu1 %vm1041_vm4, %v2066_v45 }
0x106a   : > { %3378 = vmatpush3.xpose.msk.msra.mxu1 %vm964_vm3, %v2151_v33  ;;  %3379 = vmatprep.mubr.msk.f32.mxu1 %vm4048_vm2, %v4047_v55 }
0x106b   : > { %3382 = vmatprep.subr.mxu1 %v4047_v55 }
0x106d   : > { %3380 = vmatmul.mubr.msk.f32.vlgmr.msra.gmra.mrb[30].mxu1 %vm964_vm3, %v2149_v46 }
0x106e   : > { %3384 = vmatprep.mubr.msk.f32.mxu1 %vm4048_vm2, %v4047_v55 }
0x113c   : > { %v2139_v0 = vpop.f32.mrb[28].mxu1 }
0x113d   : > { %v3376_v49 = vpop.f32.mrb[29].mxu1 }
0x1140   : > { %v2222_v48 = vpop.f32.mrb[30].mxu1 }
0x1141   : > { %v2223_v51 = vadd.f32 %v4639_v52, %v2222_v48  ;;  %v3381_v53 = vpop.f32.mrb[31].mxu1  ;;  %v2457_v48 = vld [vmem:[%s4431_s12 + $0x8] sm:$0xff] }
0x1142   : > { %v2456_v53 = vld [vmem:[%s4431_s12] sm:$0xff] }
0x1143   : > { %v2226_v3 = vsel %vm1041_vm4, %v2223_v51, -inf }
0x1144   : > { %2227 = vmax.xlane.f32.xlu1 %v2226_v3 }
0x1155   : > { %2237 = vrot.lane.b32.xlu1 %v4561_v47, %s4051_s11 }
0x1159   : > { %1465 = vrot.lane.b32.xlu1 %v4614_v7, %s4050_s1 }
0x115d   : > { %1974 = vrot.lane.b32.xlu1 %v1969_v29, %s4051_s11  ;;  %v2333_v29 = vld [vmem:[%s4425_s22 + $0x68] sm:$0xff] }
0x115e   : > { %v3542_v30 = vpack.c.bf16 %v2333_v29, %v2332_v28  ;;  %v2479_v28 = vld [vmem:[%s4431_s12 + $0xb8] sm:$0xff]  ;;  %v2476_v29 = vld [vmem:[%s4431_s12 + $0xa0] sm:$0xff] }
0x115f   : > { %v3570_v32 = vpack.c.bf16 %v2479_v28, %v2477_v26  ;;  %v2621_v28 = vld [vmem:[%s4433_s27 + $0xc8] sm:$0xff] }
0x1161   : > { %1636 = vrot.lane.b32.xlu1 %v4637_v50, %s4049_s18 }
0x1165   : > { %2144 = vrot.lane.b32.xlu1 %v2139_v0, %s4050_s1 }
0x11d1   : > { %v2228_v56 = vpop.xlane.xlu1 %2227 }
0x11d2   : > { %v2229_v61 = vsub.f32 %v2223_v51, %v2228_v56  ;;  %v2459_v51 = vld [vmem:[%s4431_s12 + $0x18] sm:$0xff]  ;;  %v2458_v56 = vld [vmem:[%s4431_s12 + $0x10] sm:$0xff] }
0x11d3   : > { %v3550_v3 = vpack.c.bf16 %v2459_v51, %v2457_v48  ;;  %v2597_v51 = vld [vmem:[%s4433_s27 + $0x8] sm:$0xff] }
0x11d4   : > { %v2230_v52 = vmul.f32 1.442695, %v2229_v61  ;;  %v2461_v61 = vld [vmem:[%s4431_s12 + $0x28] sm:$0xff] }
0x11d5   : > { %v2238_v62 = vpop.permute.xlu1 %2237 }
0x11d6   : > { %3741 = vpow2.f32 %v2230_v52  ;;  %3383 = vmatpush3.msra.mxu1 %v2238_v62  ;;  %v2463_v52 = vld [vmem:[%s4431_s12 + $0x38] sm:$0xff]  ;;  %v3552_v62 = vpack.c.bf16 %v2458_v56, %v2456_v53  ;;  %v2614_v53 = vld [vmem:[%s4433_s27 + $0x90] sm:$0xff] }
0x11d7   : > { %3551 = vmatprep.subr.bf16.mxu1 %v3550_v3  ;;  %v2615_v3 = vld [vmem:[%s4433_s27 + $0x98] sm:$0xff] }
0x11d9   : > { %v1466_v63 = vpop.permute.xlu1 %1465 }
0x11dd   : > { %v1975_v1 = vpop.permute.xlu1 %1974 }
0x11de   : > { %1977 = vst.msk [vmem:[#allocation3 + $0x8] sm:$0xff] %vm1297_vm5, %v1975_v1  ;;  %v2460_v1 = vld [vmem:[%s4431_s12 + $0x20] sm:$0xff] }
0x11e0   : > { %v3742_v47 = vpop.eup %3741 }
0x11e1   : > { %v1637_v2 = vpop.permute.xlu1 %1636  ;;  %v2232_v7 = vsel %vm1041_vm4, %v3742_v47, 0.0 }
0x11e2   : > { %2233 = vadd.xlane.f32.xlu0 %v2232_v7 }
0x11e5   : > { %v2145_v5 = vpop.permute.xlu1 %2144 }
0x11e6   : > { %2147 = vst.msk [vmem:[#allocation3 + $0x8] sm:$0xff] %vm1468_vm6, %v2145_v5  ;;  %v2464_v5 = vld [vmem:[%s4431_s12 + $0x40] sm:$0xff] }
0x11f8   : > { %1294 = vrot.lane.b32.xlu0 %v4599_v4, %s4051_s11  ;;  %v2320_v4 = vld [vmem:[%s4425_s22] sm:$0xff]  ;;  %s4921_s22 = sld [smem:[#allocation23_spill]] }
0x11f9   : > { %v3518_v13 = vpack.c.bf16 %v2321_v11, %v2320_v4 }
0x11fb   : > { %3519 = vmatprep.subr.bf16.mxu0 %v3518_v13 }
0x11fc   : > { %3521 = vmatpush3.bf16.msra.mxu0 %v3518_v13 }
0x11fd   : > { %3523 = vmatprep.subr.bf16.mxu0 %v3522_v15 }
0x11fe   : > { %p3048_p10 = scmp.ne.s32.totalorder %s4921_s22, 1 }
0x1200   : > { %3525 = vmatpush3.bf16.msra.mxu0 %v3522_v15  ;;  %v2469_v15 = vld [vmem:[%s4431_s12 + $0x68] sm:$0xff] }
0x1201   : > { %3527 = vmatprep.subr.bf16.mxu0 %v3526_v18  ;;  %v3562_v17 = vpack.c.bf16 %v2471_v16, %v2469_v15 }
0x1204   : > { %3529 = vmatpush3.bf16.msra.mxu0 %v3526_v18  ;;  %v2468_v18 = vld [vmem:[%s4431_s12 + $0x60] sm:$0xff] }
0x1205   : > { %3531 = vmatprep.subr.bf16.mxu0 %v3530_v21  ;;  %v3564_v20 = vpack.c.bf16 %v2470_v19, %v2468_v18 }
0x1208   : > { %3533 = vmatpush3.bf16.msra.mxu0 %v3530_v21  ;;  %v2473_v21 = vld [vmem:[%s4431_s12 + $0x88] sm:$0xff] }
0x1209   : > { %3535 = vmatprep.subr.bf16.mxu0 %v3534_v24  ;;  %v3566_v23 = vpack.c.bf16 %v2475_v22, %v2473_v21 }
0x120c   : > { %3537 = vmatpush3.bf16.msra.mxu0 %v3534_v24  ;;  %v2472_v24 = vld [vmem:[%s4431_s12 + $0x80] sm:$0xff] }
0x120d   : > { %3539 = vmatprep.subr.bf16.mxu0 %v3538_v27 }
0x1210   : > { %3541 = vmatpush3.bf16.msra.mxu0 %v3538_v27  ;;  %v3568_v27 = vpack.c.bf16 %v2474_v25, %v2472_v24  ;;  %v2602_v24 = vld [vmem:[%s4433_s27 + $0x30] sm:$0xff]  ;;  %v2603_v25 = vld [vmem:[%s4433_s27 + $0x38] sm:$0xff] }
0x1211   : > { %3543 = vmatprep.subr.bf16.mxu0 %v3542_v30  ;;  %v3596_v26 = vpack.c.bf16 %v2603_v25, %v2602_v24 }
0x1214   : > { %3545 = vmatpush3.bf16.msra.mxu0 %v3542_v30  ;;  %v2478_v30 = vld [vmem:[%s4431_s12 + $0xb0] sm:$0xff] }
0x1215   : > { %3547 = vmatprep.subr.bf16.mxu0 %v3546_v35 }
0x1218   : > { %3549 = vmatpush3.bf16.msra.mxu0 %v3546_v35  ;;  %v2483_v35 = vld [vmem:[%s4431_s12 + $0xd8] sm:$0xff] }
0x126f   : > { %v2234_v50 = vpop.xlane.xlu0 %2233 }
0x1270   : > { %3743 = vrcp.f32 %v2234_v50  ;;  %v2466_v50 = vld [vmem:[%s4431_s12 + $0x50] sm:$0xff] }
0x1273   : > { %v1295_v6 = vpop.permute.xlu0 %1294 }
0x1274   : > { %1298 = vst.msk [vmem:[#allocation3] sm:$0xff] %vm1297_vm5, %v1295_v6  ;;  %v3560_v6 = vpack.c.bf16 %v2466_v50, %v2464_v5 }
0x1275   : > { %1469 = vst.msk [vmem:[#allocation3] sm:$0xff] %vm1468_vm6, %v1466_v63  ;;  %v3554_v63 = vpack.c.bf16 %v2463_v52, %v2461_v61  ;;  %v3586_v61 = vpack.c.bf16 %v2615_v3, %v2614_v53  ;;  %v2598_v52 = vld [vmem:[%s4433_s27 + $0x10] sm:$0xff]  ;;  %v671_v53 = vld [vmem:[%s4449_s26] sm:$0x3] }
0x1276   : > { %1640 = vst.msk [vmem:[#allocation3] sm:$0xff] %vm1639_vm7, %v1637_v2  ;;  %v2467_v2 = vld [vmem:[%s4431_s12 + $0x58] sm:$0xff]  ;;  %v2492_v3 = vrot.slane %v671_v53, %v690_v60 }
0x127a   : > { %v3744_v8 = vpop.eup %3743 }
0x127b   : > { %v2236_v9 = vmul.f32 %v3744_v8, %v3742_v47  ;;  %v2465_v47 = vld [vmem:[%s4431_s12 + $0x48] sm:$0xff] }
0x127c   : > { %v3558_v7 = vpack.c.bf16 %v2467_v2, %v2465_v47  ;;  %v2600_v2 = vld [vmem:[%s4433_s27 + $0x20] sm:$0xff] }
0x127d   : > { %3385 = vmatmul.mubr.msk.f32.vlgmr.msra.gmra.mrb[32].mxu1 %vm1041_vm4, %v2236_v9  ;;  %v2318_v10 = vld [vmem:[#allocation3] sm:$0xff] }
0x127e   : > { %3419 = vmatprep.mubr.f32.mxu0 %v2318_v10  ;;  %2563 = vmatprep.mubr.f32.mxu1 %v4047_v55 }
0x127f   : > { %3553 = vmatpush1.bf16.msra.mxu1 %v3552_v62  ;;  %v2599_v62 = vld [vmem:[%s4433_s27 + $0x18] sm:$0xff] }
0x1280   : > { %3555 = vmatprep.subr.bf16.mxu1 %v3554_v63  ;;  %v2616_v63 = vld [vmem:[%s4433_s27 + $0xa0] sm:$0xff] }
0x1350   : > { %v2309_v36 = vpop.f32.mrb[32].mxu1 }
0x1351   : > { %2314 = vrot.lane.b32.xlu0 %v2309_v36, %s4049_s18  ;;  %v3386_v37 = vpop.f32.mrb[33].mxu1  ;;  %v3572_v36 = vpack.c.bf16 %v2478_v30, %v2476_v29  ;;  %v2604_v29 = vld [vmem:[%s4433_s27 + $0x40] sm:$0xff]  ;;  %v2605_v30 = vld [vmem:[%s4433_s27 + $0x48] sm:$0xff] }
0x1352   : > { %v3574_v37 = vpack.c.bf16 %v2483_v35, %v2481_v34  ;;  %v2622_v34 = vld [vmem:[%s4433_s27 + $0xd0] sm:$0xff]  ;;  %v2623_v35 = vld [vmem:[%s4433_s27 + $0xd8] sm:$0xff] }
0x13c3   : > { %v2315_v38 = vpop.permute.xlu0 %2314 }
0x13c4   : > { %2317 = vst.msk [vmem:[#allocation3 + $0x8] sm:$0xff] %vm1639_vm7, %v2315_v38  ;;  %v2480_v38 = vld [vmem:[%s4431_s12 + $0xc0] sm:$0xff] }
0x13cb   : > { %v2319_v39 = vld [vmem:[#allocation3 + $0x8] sm:$0xff] }
0x13cc   : > { %3420 = vmatmul.mubr.f32.vlgmr.msra.gmra.mrb[4].mxu0 %v2319_v39  ;;  %v2482_v39 = vld [vmem:[%s4431_s12 + $0xd0] sm:$0xff] }
0x149f   : > { %v3421_v42 = vpop.f32.mrb[4].mxu0 }
0x14a0   : > { %v2412_v43 = vadd.f32 %v3421_v42, %v2339_v41  ;;  %v2406_v44 = vpop.f32.mrb[5].mxu0  ;;  %v3576_v42 = vpack.c.bf16 %v2482_v39, %v2480_v38  ;;  %v2607_v38 = vld [vmem:[%s4433_s27 + $0x58] sm:$0xff] }
0x14a1   : > { %v2407_v45 = vadd.f32 %v2406_v44, %v2339_v41  ;;  %v2487_v41 = vld [vmem:[%s4431_s12 + $0xf8] sm:$0xff]  ;;  %v2484_v44 = vld [vmem:[%s4431_s12 + $0xe0] sm:$0xff] }
0x14a2   : > { %vm2416_vm8 = vcmp.ne.f32.partialorder %v2412_v43, %v2412_v43 }
0x14a3   : > { %vm2415_vm9 = vcmp.ne.f32.partialorder %v2407_v45, %v2407_v45  ;;  %v2418_v33 = vsel %vm2416_vm8, 0.0, %v2412_v43  ;;  %v3578_v43 = vpack.c.bf16 %v2487_v41, %v2485_v40  ;;  %v2624_v40 = vld [vmem:[%s4433_s27 + $0xe0] sm:$0xff]  ;;  %v2625_v41 = vld [vmem:[%s4433_s27 + $0xe8] sm:$0xff] }
0x14a4   : > { %v2420_v46 = vadd.f32 %v2418_v33, %v4497_v54  ;;  %v2417_v0 = vsel %vm2415_vm9, 0.0, %v2407_v45  ;;  %v2462_v54 = vld [vmem:[%s4431_s12 + $0x30] sm:$0xff] }
0x14a5   : > { %v2419_v49 = vadd.f32 %v2417_v0, %v4479_v31  ;;  %v3556_v31 = vpack.c.bf16 %v2462_v54, %v2460_v1  ;;  %v2486_v45 = vld [vmem:[%s4431_s12 + $0xf0] sm:$0xff]  ;;  %v2613_v0 = vld [vmem:[%s4433_s27 + $0x88] sm:$0xff]  ;;  %v3588_v54 = vpack.c.bf16 %v2599_v62, %v2598_v52 }
0x14a6   : > { %2423 = vadd.xlane.f32.xlu0 %v2420_v46  ;;  %v3580_v33 = vpack.c.bf16 %v2486_v45, %v2484_v44  ;;  %v2617_v1 = vld [vmem:[%s4433_s27 + $0xa8] sm:$0xff] }
0x14a7   : > { %2421 = vadd.xlane.f32.xlu1 %v2419_v49  ;;  %3557 = vmatpush1.bf16.msra.mxu1 %v3556_v31  ;;  %v3590_v47 = vpack.c.bf16 %v2617_v1, %v2616_v63  ;;  %v2601_v31 = vld [vmem:[%s4433_s27 + $0x28] sm:$0xff] }
0x14a8   : > { %3559 = vmatprep.subr.bf16.mxu1 %v3558_v7  ;;  %v3592_v7 = vpack.c.bf16 %v2601_v31, %v2600_v2  ;;  %v2609_v44 = vld [vmem:[%s4433_s27 + $0x68] sm:$0xff] }
0x14ab   : > { %3561 = vmatpush1.bf16.msra.mxu1 %v3560_v6 }
0x14ac   : > { %3563 = vmatprep.subr.bf16.mxu1 %v3562_v17 }
0x14af   : > { %3565 = vmatpush1.bf16.msra.mxu1 %v3564_v20 }
0x14b0   : > { %3567 = vmatprep.subr.bf16.mxu1 %v3566_v23 }
0x14b3   : > { %3569 = vmatpush1.bf16.msra.mxu1 %v3568_v27  ;;  %v2620_v27 = vld [vmem:[%s4433_s27 + $0xc0] sm:$0xff] }
0x14b4   : > { %3571 = vmatprep.subr.bf16.mxu1 %v3570_v32  ;;  %v3600_v32 = vpack.c.bf16 %v2605_v30, %v2604_v29 }
0x14b7   : > { %3573 = vmatpush1.bf16.msra.mxu1 %v3572_v36  ;;  %v3602_v36 = vpack.c.bf16 %v2623_v35, %v2622_v34 }
0x14b8   : > { %3575 = vmatprep.subr.bf16.mxu1 %v3574_v37  ;;  %v2606_v37 = vld [vmem:[%s4433_s27 + $0x50] sm:$0xff] }
0x14b9   : > { %v3604_v39 = vpack.c.bf16 %v2607_v38, %v2606_v37 }
0x14bb   : > { %3577 = vmatpush1.bf16.msra.mxu1 %v3576_v42  ;;  %v3606_v42 = vpack.c.bf16 %v2625_v41, %v2624_v40 }
0x14bc   : > { %3579 = vmatprep.subr.bf16.mxu1 %v3578_v43  ;;  %v2608_v43 = vld [vmem:[%s4433_s27 + $0x60] sm:$0xff] }
0x14bd   : > { %v3608_v45 = vpack.c.bf16 %v2609_v44, %v2608_v43 }
0x14bf   : > { %3581 = vmatpush1.bf16.msra.mxu1 %v3580_v33  ;;  %v2626_v33 = vld [vmem:[%s4433_s27 + $0xf0] sm:$0xff] }
0x1533   : > { %v2424_v8 = vpop.xlane.xlu0 %2423 }
0x1534   : > { %v2427_v9 = vmul.f32 0.0078125, %v2424_v8  ;;  %v2422_v10 = vpop.xlane.xlu1 %2421 }
0x1535   : > { %v2426_v4 = vmul.f32 0.0078125, %v2422_v10 }
0x1536   : > { %v4743_v11 = vsub.f32 %v2420_v46, %v2427_v9  ;;  %v2612_v46 = vld [vmem:[%s4433_s27 + $0x80] sm:$0xff] }
0x1537   : > { %v4745_v12 = vsub.f32 %v2419_v49, %v2426_v4  ;;  %v2596_v49 = vld [vmem:[%s4433_s27] sm:$0xff]  ;;  %v3582_v48 = vpack.c.bf16 %v2613_v0, %v2612_v46  ;;  %v2446_v4 = vsub.s32 4, %v4505_v57  ;;  %v2627_v46 = vld [vmem:[%s4433_s27 + $0xf8] sm:$0xff] }
0x1538   : > { %v2431_v13 = vmul.f32 %v4743_v11, %v4743_v11  ;;  %v3584_v56 = vpack.c.bf16 %v2597_v51, %v2596_v49  ;;  %v3610_v0 = vpack.c.bf16 %v2627_v46, %v2626_v33  ;;  %v2610_v49 = vld [vmem:[%s4433_s27 + $0x70] sm:$0xff] }
0x1539   : > { %v2430_v14 = vmul.f32 %v4745_v12, %v4745_v12  ;;  %3583 = vmatprep.subr.bf16.mxu0 %v3582_v48  ;;  %v2447_v15 = vrot.slane %v4509_v59, %v2446_v4  ;;  %v2611_v48 = vld [vmem:[%s4433_s27 + $0x78] sm:$0xff] }
0x153a   : > { %2434 = vadd.xlane.f32.xlu1 %v2431_v13  ;;  %3585 = vmatpush3.bf16.msra.mxu0 %v3584_v56  ;;  %v2452_v13 = vsub.s32 5, %v4505_v57  ;;  %v3612_v51 = vpack.c.bf16 %v2611_v48, %v2610_v49  ;;  %v2496_v56 = vrot.slane %v671_v53, %v787_v58 }
0x153b   : > { %2432 = vadd.xlane.f32.xlu0 %v2430_v14  ;;  %3587 = vmatprep.subr.bf16.mxu0 %v3586_v61 }
0x153c   : > { %v2453_v18 = vrot.slane %v4509_v59, %v2452_v13  ;;  %v2619_v59 = vld [vmem:[%s4433_s27 + $0xb8] sm:$0xff] }
0x153e   : > { %3589 = vmatpush3.bf16.msra.mxu0 %v3588_v54 }
0x153f   : > { %3591 = vmatprep.subr.bf16.mxu0 %v3590_v47 }
0x1542   : > { %3593 = vmatpush3.bf16.msra.mxu0 %v3592_v7 }
0x15c7   : > { %v2435_v5 = vpop.xlane.xlu1 %2434 }
0x15c8   : > { %v2437_v50 = vmul.f32 0.0078125, %v2435_v5  ;;  %v2433_v6 = vpop.xlane.xlu0 %2432 }
0x15c9   : > { %v2436_v8 = vmul.f32 0.0078125, %v2433_v6 }
0x15ca   : > { %v2439_v9 = vadd.f32 1e-05, %v2437_v50 }
0x15cb   : > { %v2438_v10 = vadd.f32 1e-05, %v2436_v8 }
0x15cc   : > { %3745 = vrsqrt.f32 %v2439_v9 }
0x15cd   : > { %3747 = vrsqrt.f32 %v2438_v10 }
0x15d6   : > { %v3746_v14 = vpop.eup %3745 }
0x15d7   : > { %v3748_v16 = vpop.eup %3747  ;;  %v2443_v19 = vmul.f32 %v3746_v14, %v4743_v11 }
0x15d8   : > { %v2442_v17 = vmul.f32 %v3748_v16, %v4745_v12  ;;  %v2618_v12 = vld [vmem:[%s4433_s27 + $0xb0] sm:$0xff] }
0x15d9   : > { %v2449_v22 = vmul.f32 %v2447_v15, %v2443_v19  ;;  %v3594_v11 = vpack.c.bf16 %v2619_v59, %v2618_v12  ;;  %v2630_v12 = vsub.s32 6, %v4505_v57 }
0x15da   : > { %v2448_v20 = vmul.f32 %v2447_v15, %v2442_v17 }
0x15db   : > { %v4793_v23 = vadd.f32 %v2453_v18, %v2449_v22  ;;  %3595 = vmatprep.subr.bf16.mxu0 %v3594_v11  ;;  %v3761_v11 = vld [vmem:[%s4444_s16] sm:$0xff] }
0x15dc   : > { %v4789_v21 = vadd.f32 %v2453_v18, %v2448_v20  ;;  %3597 = vmatpush3.bf16.msra.mxu0 %v3596_v26  ;;  %v2631_v24 = vrot.slane %v3761_v11, %v2630_v12 }
0x15de   : > { %2564 = vmatmul.mubr.f32.vlgmr.msra.gmra.mrb[34].mxu1 %v4789_v21 }
0x15df   : > { %2569 = vmatprep.mubr.f32.mxu1 %v4047_v55  ;;  %v3598_v55 = vpack.c.bf16 %v2621_v28, %v2620_v27 }
0x15e1   : > { %3599 = vmatprep.subr.bf16.mxu0 %v3598_v55 }
0x15e2   : > { %2570 = vmatmul.mubr.f32.gmra.mrb[36].mxu1 %v4793_v23  ;;  %3601 = vmatpush3.bf16.msra.mxu0 %v3600_v32 }
0x15e3   : > { %3603 = vmatprep.subr.bf16.mxu0 %v3602_v36 }
0x15e6   : > { %3605 = vmatpush3.bf16.msra.mxu0 %v3604_v39 }
0x15e7   : > { %3607 = vmatprep.subr.bf16.mxu0 %v3606_v42 }
0x15ea   : > { %3609 = vmatpush3.bf16.msra.mxu0 %v3608_v45 }
0x15eb   : > { %3611 = vmatprep.subr.bf16.mxu0 %v3610_v0 }
0x15ee   : > { %3613 = vmatpush3.bf16.msra.mxu0 %v3612_v51  ;;  %v3047_v51 = vld [vmem:[%s4444_s16 + $0x8] ss:$0 sm:$0xff] }
0x16b1   : > { %v2565_v61 = vpop.f32.mrb[34].mxu1 }
0x16b2   : > { %v2566_v52 = vadd.f32 %v2565_v61, %v2492_v3  ;;  %v2567_v62 = vpop.f32.mrb[35].mxu1 }
0x16b3   : > { %v2568_v63 = vadd.f32 %v2567_v62, %v2496_v56 }
0x16b4   : > { %v2580_v1 = vmul.f32 0.70710677, %v2566_v52  ;;  %v2576_v10 = vmul.f32 0.5, %v2566_v52 }
0x16b5   : > { %v2581_v54 = vmul.f32 0.70710677, %v2568_v63  ;;  %v2571_v47 = vpop.f32.mrb[36].mxu1  ;;  %v2577_v58 = vmul.f32 0.5, %v2568_v63 }
0x16b6   : > { %3749 = verf.f32 %v2580_v1  ;;  %v2572_v2 = vadd.f32 %v2571_v47, %v2492_v3  ;;  %v2573_v31 = vpop.f32.mrb[37].mxu1 }
0x16b7   : > { %3751 = verf.f32 %v2581_v54  ;;  %v2574_v7 = vadd.f32 %v2573_v31, %v2496_v56 }
0x16b8   : > { %v2582_v5 = vmul.f32 0.70710677, %v2572_v2  ;;  %v2578_v19 = vmul.f32 0.5, %v2572_v2 }
0x16b9   : > { %v2583_v50 = vmul.f32 0.70710677, %v2574_v7  ;;  %v2579_v17 = vmul.f32 0.5, %v2574_v7 }
0x16ba   : > { %3753 = verf.f32 %v2582_v5 }
0x16bb   : > { %3755 = verf.f32 %v2583_v50 }
0x16c0   : > { %v3750_v60 = vpop.eup %3749 }
0x16c1   : > { %v3752_v6 = vpop.eup %3751  ;;  %v2588_v8 = vadd.f32 1.0, %v3750_v60 }
0x16c2   : > { %v2589_v9 = vadd.f32 1.0, %v3752_v6 }
0x16c3   : > { %v2592_v15 = vmul.f32 %v2588_v8, %v2576_v10 }
0x16c4   : > { %v3754_v4 = vpop.eup %3753  ;;  %v2593_v13 = vmul.f32 %v2589_v9, %v2577_v58 }
0x16c5   : > { %v3756_v14 = vpop.eup %3755  ;;  %v2590_v16 = vadd.f32 1.0, %v3754_v4 }
0x16c6   : > { %v2591_v18 = vadd.f32 1.0, %v3756_v14  ;;  %2696 = vmatprep.mubr.f32.mxu0 %v2593_v13 }
0x16c7   : > { %2697 = vmatmul.mubr.f32.vlgmr.msra.gmra.mrb[6].mxu0 %v2592_v15  ;;  %v2594_v22 = vmul.f32 %v2590_v16, %v2578_v19 }
0x16c8   : > { %v2595_v20 = vmul.f32 %v2591_v18, %v2579_v17 }
0x16ca   : > { %2701 = vmatprep.mubr.f32.mxu0 %v2595_v20 }
0x16cb   : > { %2702 = vmatmul.mubr.f32.gmra.mrb[8].mxu0 %v2594_v22 }
0x179a   : > { %v3196_v59 = vpop.f32.mrb[6].mxu0 }
0x179b   : > { %v3197_v25 = vpop.f32.mrb[7].mxu0 }
0x179c   : > { %v3198_v26 = vadd.f32 %v3197_v25, %v3196_v59 }
0x179e   : > { %v2699_v27 = vadd.f32 %v3198_v26, %v2631_v24  ;;  %v3199_v28 = vpop.f32.mrb[8].mxu0 }
0x179f   : > { %v3200_v55 = vpop.f32.mrb[9].mxu0 }
0x17a0   : > { %v3201_v29 = vadd.f32 %v3200_v55, %v3199_v28  ;;  %v2707_v30 = vadd.f32 %v2699_v27, %v4789_v21 }
0x17a2   : > { %v2704_v32 = vadd.f32 %v3201_v29, %v2631_v24  ;;  %2709 = vadd.xlane.f32.xlu0 %v2707_v30 }
0x17a4   : > { %v2708_v34 = vadd.f32 %v2704_v32, %v4793_v23  ;;  %v2733_v23 = vsub.s32 7, %v4505_v57 }
0x17a6   : > { %2711 = vadd.xlane.f32.xlu1 %v2708_v34  ;;  %v2734_v0 = vrot.slane %v3761_v11, %v2733_v23 }
0x182f   : > { %v2710_v35 = vpop.xlane.xlu0 %2709 }
0x1830   : > { %v2713_v36 = vmul.f32 0.0078125, %v2710_v35 }
0x1832   : > { %v2715_v37 = vsub.f32 %v2707_v30, %v2713_v36 }
0x1833   : > { %v2712_v38 = vpop.xlane.xlu1 %2711 }
0x1834   : > { %v2714_v39 = vmul.f32 0.0078125, %v2712_v38  ;;  %v2717_v40 = vmul.f32 %v2715_v37, %v2715_v37 }
0x1836   : > { %v2716_v41 = vsub.f32 %v2708_v34, %v2714_v39  ;;  %2719 = vadd.xlane.f32.xlu0 %v2717_v40 }
0x1838   : > { %v2718_v42 = vmul.f32 %v2716_v41, %v2716_v41 }
0x183a   : > { %2721 = vadd.xlane.f32.xlu1 %v2718_v42 }
0x18c3   : > { %v2720_v43 = vpop.xlane.xlu0 %2719 }
0x18c4   : > { %v2723_v44 = vmul.f32 0.0078125, %v2720_v43 }
0x18c6   : > { %v2725_v45 = vadd.f32 1e-05, %v2723_v44 }
0x18c7   : > { %v2722_v21 = vpop.xlane.xlu1 %2721 }
0x18c8   : > { %3757 = vrsqrt.f32 %v2725_v45  ;;  %v2724_v33 = vmul.f32 0.0078125, %v2722_v21 }
0x18ca   : > { %v2726_v46 = vadd.f32 1e-05, %v2724_v33 }
0x18cc   : > { %3759 = vrsqrt.f32 %v2726_v46 }
0x18d2   : > { %v3758_v49 = vpop.eup %3757 }
0x18d3   : > { %v2729_v48 = vmul.f32 %v3758_v49, %v2715_v37 }
0x18d5   : > { %v2735_v53 = vmul.f32 %v2734_v0, %v2729_v48 }
0x18d6   : > { %v3760_v3 = vpop.eup %3759 }
0x18d7   : > { %v2741_v56 = vadd.f32 %v3047_v51, %v2735_v53  ;;  %v2730_v61 = vmul.f32 %v3760_v3, %v2716_v41  ;;  %2748 = sbr.rel (%p3048_p10) target bundleno = 6366 (0x18de), region = 92 }
0x18d9   : > { %2743 = vst [vmem:[#allocation2] sm:$0xff] %v2741_v56  ;;  %v2736_v52 = vmul.f32 %v2734_v0, %v2730_v61  ;;  %2749 = vst [vmem:[#allocation16] sm:$0xff] (!%p3048_p10), %v2741_v56 }
0x18db   : > { %v2742_v62 = vadd.f32 %v3047_v51, %v2736_v52 }
0x18dd   : > { %2744 = vst [vmem:[#allocation2 + $0x8] sm:$0xff] %v2742_v62  ;;  %2750 = vst [vmem:[#allocation16 + $0x8] sm:$0xff] (!%p3048_p10), %v2742_v62 }
0x18de PF: > { %p3650_p3 = scmp.eq.s32.totalorder %s4139_s19, 1  ;;  %s4052_s12 = smov [#allocation16]  }
0x18df   : > { %s2760_s27 = sshll.u32 %s4052_s12, 4  ;;  %s2761_s27 = int_to_ptr.vmem [resolvable:$true] %s2760_s27 }
0x18e0   : > { %s3942_s21 = scalar_lea.vmem %s2761_s27, 256  ;;  %p3949_p0 = scmp.lt.s32.totalorder %s2761_s27, %s2761_s27 }
0x18e1   : > { %p3943_p7 = scmp.ne.s32.totalorder %s2761_s27, %s3942_s21  ;;  %p3950_p6 = scmp.lt.s32.totalorder %s3942_s21, %s3942_s21 }
0x18e3   : > { %p3944_p4 = pnand %p3943_p7, %p3650_p3  ;;  %p3951_p5 = por %p3950_p6, %p3949_p0 }
0x18e5   : > { %p3945_p8 = pneg %p3944_p4 }
0x18e7   : > { %p3952_p1 = pnand %p3951_p5, %p3945_p8 }
0x18e9   : > { %3955 = shalt.err (!%p3952_p1)
}
0x18ea   : > { %s4922_s3 = sld [smem:[#allocation33_spill]] }
0x18f0   : > { %s3956_s29 = scalar_lea.hbm %s4922_s3, 256 }
0x18f1   : > { %p3957_p11 = scmp.ne.s32.totalorder %s4922_s3, %s3956_s29  ;;  %p3962_p9 = scmp.lt.u32.totalorder %s3956_s29, %s4922_s3 }
0x18f3   : > { %p3958_p12 = pnand %p3957_p11, %p3650_p3 }
0x18f5   : > { %p3959_p13 = pneg %p3958_p12 }
0x18f7   : > { %p3964_p2 = pnand %p3962_p9, %p3959_p13 }
0x18f9   : > { %3967 = shalt.err (!%p3964_p2)
}
0x18fa   : > { %s4053_s26 = smov 128   ;;  %s4054_s23 = smov 8  }
0x18fb   : > { %3627 = dma.vmem_to_hbm [thread:$0]  (%p3650_p3), %s2761_s27, 256, %s4922_s3, [#allocation7], %s4053_s26, %s4053_s26, %s4054_s23  }
0x18fc   : > { %4009 = dma.done.wait (%p3650_p3), [#allocation7], 256  }
0x18fd   : > { %4011 = vsyncadd (%p3650_p3), [#allocation7], 4294967040 }
0x18fe PF: > { %s4923_s0 = sld [smem:[#allocation24_spill]]  ;;  %s4924_s9 = sld [smem:[#allocation22_spill]] }
0x18ff   : > { %s4925_s15 = sld [smem:[#allocation26_spill]]  ;;  %s4926_s30 = sld [smem:[#allocation25_spill]] }
0x1900   : > { %s4927_s13 = smov %s4018_s14  ;;  %s4929_s16 = smov %s4030_s17 }
0x1904   : > { %s33_s18 = sadd.s32 1, %s4923_s0   ;;  %s4928_s14 = smov %s4924_s9 }
0x1905   : > { %p30_p10 = scmp.ge.s32.totalorder %s33_s18, 4   ;;  %s4930_s17 = smov %s4926_s30 }
0x1907   :  { %32 = sbr.rel (!%p30_p10) target bundleno = 19 (0x13), region = 179 }
0x190e   :  { %2776 = vsyncpa [#allocation6], 1 }
0x190f   :  { %2778 = vsyncpa [#allocation6 + $0x1], 1 }
0x1910   :  { %2779 = vsyncpa [#allocation9], 1 }
0x1911   :  { %2781 = vsyncpa [#allocation9 + $0x1], 1 }
0x1912   :  { %2782 = vsyncpa [#allocation12], 1 }
0x1913   :  { %2784 = vsyncpa [#allocation12 + $0x1], 1 }
0x1914   :  { %2785 = vsyncpa [#allocation15], 1 }
0x1915   :  { %2787 = vsyncpa [#allocation15 + $0x1], 1 }
0x1916   :  { %2788 = vsyncpa [#allocation7], 1 }
0x1917   :  { %2790 = vsyncpa [#allocation7 + $0x1], 1 }

</bundles_post_ra>
